<compile_context>
chip_gen: v7x
topology: tpu7x:2x2x1
jax: 0.10.0
libtpu: 0.0.40
codegen_flags: <defaults>
</compile_context>

<pallas_src>
import math

import numpy as np
import jax
import jax.numpy as jnp
from jax import lax
from jax.experimental import pallas as pl
from jax.experimental.pallas import tpu as pltpu

# ---- problem sizes (small, consistent with the module) ----------------------
B, T, D = 2, 8, 32        # batch, time, size
H = 4                     # attention heads
DK = D // H               # per-head dim
FF = 64                   # feed-forward hidden dim
K = 7                     # depthwise conv kernel size
PAD = (K - 1) // 2
EPS_LN = 1e-12            # espnet LayerNorm eps
EPS_BN = 1e-5             # BatchNorm1d eps

ROWS = B * T              # whole batch folded into one (ROWS, D) slab
HR = H * ROWS             # head-stacked key/value rows

# ---- packed-slab layouts -----------------------------------------------------
# cvec: f32, D-wide (per-feature rows + baked constants)
(CV_LN4_G, CV_LN4_B, CV_BO, CV_DW_B, CV_BN_SCALE, CV_BN_SHIFT,
 CV_PW2_B, CV_FFM_B2, CV_FF_B2) = range(9)
CV_TAPW = 9                          # K*ROWS rows: tap weight * tap validity
CV_HMASK = CV_TAPW + K * ROWS        # HR rows: head-stacking feature mask
CV_ROWS = CV_HMASK + HR

# c64: f32, HR-wide constants (HR == FF == 64)
C64_ONES = 0                         # HR rows: per-head-block ones matrix
C64_SEQB = HR                        # ROWS rows: 0 / -1e9 block-diag seq bias
C64_ROWS = HR + ROWS

# w32: bf16, D-wide weight slab
W32_FFM_W2 = 0
W32_FF_W2 = FF
W32_WO = 2 * FF
W32_PW2 = 2 * FF + D
W32_ROWS = 2 * FF + 2 * D

# w64: bf16, FF-wide weight slab (LN-gamma folded W1s + fused GLU + bias rows)
W64_FFM_W1 = 0
W64_FF_W1 = D
W64_GLU_W = 2 * D
W64_FFM_B1 = 3 * D
W64_FF_B1 = 3 * D + 1
W64_GLU_B = 3 * D + 2
W64_ROWS = 3 * D + 3

# wqkv: bf16 (D+1, 3D): rows 0..D-1 = LN-folded (q pre-scaled) weights, row D = fused bias


def _swish(x):
    return x * jax.nn.sigmoid(x)


def _layer_norm(x, g, b):
    mu = jnp.mean(x, axis=-1, keepdims=True)
    var = jnp.mean((x - mu) ** 2, axis=-1, keepdims=True)
    return (x - mu) * lax.rsqrt(var + EPS_LN) * g + b


# -----------------------------------------------------------------------------
# Pallas kernel (single grid step, whole batch folded into ROWS rows)
# -----------------------------------------------------------------------------
def conformer_kernel(x_ref, mask_ref, cvec_ref, c64_ref, w32_ref, w64_ref,
                     wqkv_ref, out_ref):
    f32, bf16 = jnp.float32, jnp.bfloat16
    x = x_ref[0].astype(f32)                      # (ROWS, D)
    kmask = mask_ref[0]                           # (1, ROWS) 1.0 = valid key

    def vrow(i):
        return cvec_ref[i:i + 1, :]               # (1, D) broadcast row

    def ln_core(y):
        # gamma/beta are folded into the following matmul weights/bias;
        # one-pass variance: mean(y^2) - mu^2.
        mu = jnp.mean(y, axis=-1, keepdims=True)
        var = jnp.maximum(jnp.mean(y * y, axis=-1, keepdims=True) - mu * mu, 0.0)
        return (y - mu) * lax.rsqrt(var + EPS_LN)

    # ---- macaron feed-forward: x = x + 0.5 * FF_mac(LN(x)) -------------------
    resid = x
    xn = ln_core(x).astype(bf16)
    h = (jnp.dot(xn, w64_ref[W64_FFM_W1:W64_FFM_W1 + D, :],
                 preferred_element_type=f32)
         + w64_ref[W64_FFM_B1:W64_FFM_B1 + 1, :].astype(f32))
    h = _swish(h)
    h = (jnp.dot(h.astype(bf16), w32_ref[W32_FFM_W2:W32_FFM_W2 + FF, :],
                 preferred_element_type=f32) + vrow(CV_FFM_B2))
    x = resid + 0.5 * h

    # ---- multi-headed self-attention: x = x + MHA(LN(x)) ---------------------
    resid = x
    xn = ln_core(x).astype(bf16)
    qkv = (jnp.dot(xn, wqkv_ref[0:D, :], preferred_element_type=f32)
           + wqkv_ref[D:D + 1, :].astype(f32))    # (ROWS, 3D); q pre-scaled by 1/sqrt(dk)
    q = qkv[:, 0:D]
    k = qkv[:, D:2 * D]
    v = qkv[:, 2 * D:3 * D]

    # head-stacked K / V: row h*ROWS+t keeps only head h's feature columns
    hmask = cvec_ref[CV_HMASK:CV_HMASK + HR, :]   # (HR, D) constant 0/1
    k_st = jnp.concatenate([k] * H, axis=0) * hmask
    v_st = jnp.concatenate([v] * H, axis=0) * hmask

    # lane-stacked scores: columns h*ROWS:(h+1)*ROWS hold Q_h @ K_h^T
    s = jnp.einsum("td,sd->ts", q, k_st, preferred_element_type=f32)  # (ROWS, HR)
    seq_bias = c64_ref[C64_SEQB:C64_SEQB + ROWS, :]       # 0 / -1e9 block-diag const
    key_bias = (jnp.concatenate([kmask] * H, axis=1) - 1.0) * 1e9     # (1, HR)
    s = s + seq_bias + key_bias

    # NOTE: a single per-row max is shared across the lane-stacked heads; this
    # is mathematically equivalent to a per-head max (each head-block
    # denominator uses the same shift) — do not "fix" it to a per-head max.
    rowmax = jnp.max(s, axis=-1, keepdims=True)
    e = jnp.exp(s - rowmax)                       # masked entries underflow to 0
    denom = jnp.dot(e, c64_ref[C64_ONES:C64_ONES + HR, :],
                    preferred_element_type=f32)   # per-head-block sums
    p = e * pl.reciprocal(jnp.maximum(denom, 1e-30), approx=True)
    att = jnp.dot(p, v_st, preferred_element_type=f32)                # (ROWS, D)
    att = (jnp.dot(att.astype(bf16), w32_ref[W32_WO:W32_WO + D, :],
                   preferred_element_type=f32) + vrow(CV_BO))
    x = resid + att

    # ---- convolution module: x = x + Conv(LN(x)) -----------------------------
    resid = x
    xn = ln_core(x).astype(bf16)
    ab = (jnp.dot(xn, w64_ref[W64_GLU_W:W64_GLU_W + D, :],
                  preferred_element_type=f32)
          + w64_ref[W64_GLU_B:W64_GLU_B + 1, :].astype(f32))          # (ROWS, 2D)
    glu = ab[:, 0:D] * jax.nn.sigmoid(ab[:, D:2 * D])

    # depthwise conv: XLU sublane rotates + precomputed (validity * tap) weights
    acc = jnp.zeros((ROWS, D), f32)
    for j in range(K):
        sh = (PAD - j) % ROWS                     # row r sees glu[r + (j - PAD)]
        shifted = glu if sh == 0 else pltpu.roll(glu, sh, 0)
        acc = acc + shifted * cvec_ref[CV_TAPW + j * ROWS:
                                       CV_TAPW + (j + 1) * ROWS, :]
    acc = acc + vrow(CV_DW_B)
    acc = acc * vrow(CV_BN_SCALE) + vrow(CV_BN_SHIFT)   # eval-mode BatchNorm
    acc = _swish(acc)
    acc = (jnp.dot(acc.astype(bf16), w32_ref[W32_PW2:W32_PW2 + D, :],
                   preferred_element_type=f32) + vrow(CV_PW2_B))
    x = resid + acc

    # ---- feed-forward: x = x + 0.5 * FF(LN(x)) --------------------------------
    resid = x
    xn = ln_core(x).astype(bf16)
    h = (jnp.dot(xn, w64_ref[W64_FF_W1:W64_FF_W1 + D, :],
                 preferred_element_type=f32)
         + w64_ref[W64_FF_B1:W64_FF_B1 + 1, :].astype(f32))
    h = _swish(h)
    h = (jnp.dot(h.astype(bf16), w32_ref[W32_FF_W2:W32_FF_W2 + FF, :],
                 preferred_element_type=f32) + vrow(CV_FF_B2))
    x = resid + 0.5 * h

    # ---- final LayerNorm (gamma/beta applied here; no following matmul) ------
    mu = jnp.mean(x, axis=-1, keepdims=True)
    var = jnp.maximum(jnp.mean(x * x, axis=-1, keepdims=True) - mu * mu, 0.0)
    x = (x - mu) * lax.rsqrt(var + EPS_LN) * vrow(CV_LN4_G) + vrow(CV_LN4_B)
    out_ref[0] = x.astype(out_ref.dtype)


# -----------------------------------------------------------------------------
# Parameter packing (runs once, outside the forward call)
# -----------------------------------------------------------------------------
def pack_params(p):
    f32, bf16 = jnp.float32, jnp.bfloat16
    g, b = p["ln_g"], p["ln_b"]                       # (5, D) each
    scale = 1.0 / math.sqrt(DK)

    def fold(i, w, bias):
        # LN(x) @ w + bias == norm(x) @ (diag(g_i) @ w) + (b_i @ w + bias)
        return g[i][:, None] * w, bias + b[i:i + 1] @ w

    # macaron / final FF first linears (LN gamma/beta folded)
    w1m, b1m = fold(0, p["ffm_w1"], p["ffm_b1"])
    w1f, b1f = fold(3, p["ff_w1"], p["ff_b1"])
    # fused, LN-folded, pre-scaled QKV
    wq, bq = fold(1, p["wq"], p["bq"])
    wk, bk = fold(1, p["wk"], p["bk"])
    wv, bv = fold(1, p["wv"], p["bv"])
    wqkv = jnp.concatenate([wq * scale, wk, wv], axis=1)          # (D, 3D)
    bqkv = jnp.concatenate([bq * scale, bk, bv], axis=1)          # (1, 3D)
    wqkv_slab = jnp.concatenate([wqkv, bqkv], axis=0).astype(bf16)
    # fused, LN-folded GLU pointwise conv
    wa, ba = fold(2, p["pw1_wa"], p["pw1_ba"])
    wb, bb = fold(2, p["pw1_wb"], p["pw1_bb"])
    wglu = jnp.concatenate([wa, wb], axis=1)                      # (D, 2D)
    bglu = jnp.concatenate([ba, bb], axis=1)                      # (1, 2D)

    w64 = jnp.concatenate([w1m, w1f, wglu, b1m, b1f, bglu], axis=0).astype(bf16)
    w32 = jnp.concatenate([p["ffm_w2"], p["ff_w2"], p["wo"], p["pw2_w"]],
                          axis=0).astype(bf16)

    # eval-mode BatchNorm folded to scale/shift
    bn_scale = p["bn_g"] * lax.rsqrt(p["bn_v"] + EPS_BN)
    bn_shift = p["bn_b"] - p["bn_m"] * bn_scale

    # ---- baked constants (host-side) ----
    tpos = np.arange(ROWS) % T
    taps = []
    for j in range(K):
        sh = j - PAD
        valid = ((tpos + sh >= 0) & (tpos + sh < T)).astype(np.float32)[:, None]
        taps.append(jnp.asarray(valid) * p["dw_w"][j:j + 1])      # (ROWS, D)
    tapw = jnp.concatenate(taps, axis=0)                          # (K*ROWS, D)

    hmask = jnp.asarray((np.arange(HR)[:, None] // ROWS ==
                         np.arange(D)[None, :] // DK).astype(np.float32))

    cvec = jnp.concatenate(
        [g[4:5], b[4:5], p["bo"], p["dw_b"], bn_scale, bn_shift,
         p["pw2_b"], p["ffm_b2"], p["ff_b2"], tapw, hmask], axis=0).astype(f32)

    ones_blk = (np.arange(HR)[:, None] // ROWS ==
                np.arange(HR)[None, :] // ROWS).astype(np.float32)
    same_seq = ((np.arange(HR)[None, :] % ROWS) // T ==
                np.arange(ROWS)[:, None] // T)
    seq_bias = np.where(same_seq, 0.0, -1e9).astype(np.float32)
    c64 = jnp.asarray(np.concatenate([ones_blk, seq_bias], axis=0))

    assert cvec.shape == (CV_ROWS, D)
    assert c64.shape == (C64_ROWS, HR)
    assert w32.shape == (W32_ROWS, D)
    assert w64.shape == (W64_ROWS, FF)
    assert wqkv_slab.shape == (D + 1, 3 * D)
    return cvec, c64, w32, w64, wqkv_slab


# -----------------------------------------------------------------------------
# Forward wrapper
# -----------------------------------------------------------------------------
def encoder_layer(x, mask, packed):
    # Whole batch folded into one grid step on all generations: at B*T=16 rows
    # per-step overhead and duplicated param DMA dominate, so do NOT split
    # across TensorCores.  (For production sizes, grow rows per step toward
    # 128-512 and keep the output lane dim a multiple of 128 before adding
    # grid parallelism.)
    cvec, c64, w32, w64, wqkv = packed
    xf = x.reshape(1, ROWS, D)
    mf = mask.astype(jnp.float32).reshape(1, 1, ROWS)
    out = pl.pallas_call(
        conformer_kernel,
        out_shape=jax.ShapeDtypeStruct((1, ROWS, D), jnp.float32),
        grid=(1,),
        in_specs=[
            pl.BlockSpec((1, ROWS, D), lambda g: (0, 0, 0)),      # x
            pl.BlockSpec((1, 1, ROWS), lambda g: (0, 0, 0)),      # key mask
            pl.BlockSpec((CV_ROWS, D), lambda g: (0, 0)),         # f32 vec/const slab
            pl.BlockSpec((C64_ROWS, HR), lambda g: (0, 0)),       # f32 64-wide consts
            pl.BlockSpec((W32_ROWS, D), lambda g: (0, 0)),        # bf16 D-wide weights
            pl.BlockSpec((W64_ROWS, FF), lambda g: (0, 0)),       # bf16 FF-wide weights
            pl.BlockSpec((D + 1, 3 * D), lambda g: (0, 0)),       # bf16 fused QKV (+bias)
        ],
        out_specs=pl.BlockSpec((1, ROWS, D), lambda g: (0, 0, 0)),
        compiler_params=pltpu.CompilerParams(dimension_semantics=("arbitrary",)),
    )(xf, mf, cvec, c64, w32, w64, wqkv)
    return out.reshape(B, T, D)


# -----------------------------------------------------------------------------
# Pure-JAX f32 reference (mirrors PyTorch EncoderLayer eval-mode semantics)
# -----------------------------------------------------------------------------
def ref_one(x, mask, p):
    sw = _swish
    # macaron FF
    r = x
    xn = _layer_norm(x, p["ln_g"][0], p["ln_b"][0])
    h = sw(xn @ p["ffm_w1"] + p["ffm_b1"][0]) @ p["ffm_w2"] + p["ffm_b2"][0]
    x = r + 0.5 * h
    # MHA
    r = x
    xn = _layer_norm(x, p["ln_g"][1], p["ln_b"][1])
    q = xn @ p["wq"] + p["bq"][0]
    k = xn @ p["wk"] + p["bk"][0]
    v = xn @ p["wv"] + p["bv"][0]
    qh = q.reshape(T, H, DK).transpose(1, 0, 2)
    kh = k.reshape(T, H, DK).transpose(1, 0, 2)
    vh = v.reshape(T, H, DK).transpose(1, 0, 2)
    s = jnp.einsum("htd,hsd->hts", qh, kh) / math.sqrt(DK)
    valid = mask[0] > 0.0
    s = jnp.where(valid[None, None, :], s, -1e9)
    pr = jax.nn.softmax(s, axis=-1)
    pr = jnp.where(valid[None, None, :], pr, 0.0)
    o = jnp.einsum("hts,hsd->htd", pr, vh).transpose(1, 0, 2).reshape(T, D)
    x = r + (o @ p["wo"] + p["bo"][0])
    # Conv module
    r = x
    xn = _layer_norm(x, p["ln_g"][2], p["ln_b"][2])
    a = xn @ p["pw1_wa"] + p["pw1_ba"][0]
    bgate = xn @ p["pw1_wb"] + p["pw1_bb"][0]
    glu = a * jax.nn.sigmoid(bgate)
    padded = jnp.pad(glu, ((PAD, PAD), (0, 0)))
    acc = jnp.zeros((T, D), jnp.float32)
    for j in range(K):
        acc = acc + padded[j:j + T] * p["dw_w"][j]
    acc = acc + p["dw_b"][0]
    acc = (acc - p["bn_m"][0]) / jnp.sqrt(p["bn_v"][0] + EPS_BN) * p["bn_g"][0] + p["bn_b"][0]
    acc = sw(acc)
    x = r + (acc @ p["pw2_w"] + p["pw2_b"][0])
    # FF
    r = x
    xn = _layer_norm(x, p["ln_g"][3], p["ln_b"][3])
    h = sw(xn @ p["ff_w1"] + p["ff_b1"][0]) @ p["ff_w2"] + p["ff_b2"][0]
    x = r + 0.5 * h
    # final norm
    return _layer_norm(x, p["ln_g"][4], p["ln_b"][4])


# -----------------------------------------------------------------------------
# Deterministic synthetic parameters + run
# -----------------------------------------------------------------------------
def make_params(key):
    ks = iter(jax.random.split(key, 40))
    n = lambda shape, s=0.1: s * jax.random.normal(next(ks), shape, jnp.float32)
    p = {
        "ln_g": 1.0 + 0.02 * jax.random.normal(next(ks), (5, D), jnp.float32),
        "ln_b": 0.02 * jax.random.normal(next(ks), (5, D), jnp.float32),
        "ffm_w1": n((D, FF)), "ffm_b1": n((1, FF), 0.02),
        "ffm_w2": n((FF, D)), "ffm_b2": n((1, D), 0.02),
        "wq": n((D, D)), "wk": n((D, D)), "wv": n((D, D)), "wo": n((D, D)),
        "bq": n((1, D), 0.02), "bk": n((1, D), 0.02),
        "bv": n((1, D), 0.02), "bo": n((1, D), 0.02),
        "pw1_wa": n((D, D)), "pw1_ba": n((1, D), 0.02),
        "pw1_wb": n((D, D)), "pw1_bb": n((1, D), 0.02),
        "dw_w": n((K, D), 0.2), "dw_b": n((1, D), 0.02),
        "bn_g": 1.0 + 0.02 * jax.random.normal(next(ks), (1, D), jnp.float32),
        "bn_b": 0.02 * jax.random.normal(next(ks), (1, D), jnp.float32),
        "bn_m": 0.05 * jax.random.normal(next(ks), (1, D), jnp.float32),
        "bn_v": 1.0 + 0.1 * jnp.abs(jax.random.normal(next(ks), (1, D), jnp.float32)),
        "pw2_w": n((D, D)), "pw2_b": n((1, D), 0.02),
        "ff_w1": n((D, FF)), "ff_b1": n((1, FF), 0.02),
        "ff_w2": n((FF, D)), "ff_b2": n((1, D), 0.02),
    }
    return p


if __name__ == "__main__":
    key = jax.random.PRNGKey(0)
    kx, kp = jax.random.split(key)
    x = jax.random.normal(kx, (B, T, D), jnp.float32)
    mask = jnp.ones((B, 1, T), jnp.float32)
    mask = mask.at[1, 0, 6:].set(0.0)         # pad the tail of the 2nd sequence
    params = make_params(kp)

    packed = pack_params(params)              # built once, not per forward call
    fwd = jax.jit(encoder_layer)
    out = jax.block_until_ready(fwd(x, mask, packed))

    ref = jax.vmap(lambda xi, mi: ref_one(xi, mi, params))(x, mask)
    err = float(jnp.max(jnp.abs(out - ref)))
    # bf16 matmul weights + bf16 LHS casts → tolerance looser than the pure-f32
    # variant (which matched to ~3e-4); all LN/softmax/conv/BN math stays f32.
    assert err < 3e-2, f"max abs error {err}"
    # TODO(synk): dropout / stochastic-depth training paths, the `cache`
    # incremental-decoding branch and the pos_emb (rel-attention) variant are
    # not implemented (eval-mode forward only).
    print("KERNEL_OK")
</pallas_src>

<mosaic_0001>
module attributes {stable_mosaic.version = 11 : i64} {
  func.func @conformer_kernel(%arg0: i32, %arg1: memref<1x16x32xf32, #tpu.memory_space<vmem>>, %arg2: memref<1x1x16xf32, #tpu.memory_space<vmem>>, %arg3: memref<185x32xf32, #tpu.memory_space<vmem>>, %arg4: memref<80x64xf32, #tpu.memory_space<vmem>>, %arg5: memref<192x32xbf16, #tpu.memory_space<vmem>>, %arg6: memref<99x64xbf16, #tpu.memory_space<vmem>>, %arg7: memref<33x96xbf16, #tpu.memory_space<vmem>>, %arg8: memref<1x16x32xf32, #tpu.memory_space<vmem>>) attributes {dimension_semantics = [#tpu.dimension_semantics<arbitrary>], iteration_bounds = array<i64: 1>, scalar_prefetch = 0 : i64, scratch_operands = 0 : i64, tpu.core_type = #tpu.core_type<tc>, window_params = [{pipeline_mode = #tpu.pipeline_mode<synchronous>, transform_indices = @transform_0, window_bounds = array<i64: 1, 16, 32>}, {pipeline_mode = #tpu.pipeline_mode<synchronous>, transform_indices = @transform_1, window_bounds = array<i64: 1, 1, 16>}, {pipeline_mode = #tpu.pipeline_mode<synchronous>, transform_indices = @transform_2, window_bounds = array<i64: 185, 32>}, {pipeline_mode = #tpu.pipeline_mode<synchronous>, transform_indices = @transform_3, window_bounds = array<i64: 80, 64>}, {pipeline_mode = #tpu.pipeline_mode<synchronous>, transform_indices = @transform_4, window_bounds = array<i64: 192, 32>}, {pipeline_mode = #tpu.pipeline_mode<synchronous>, transform_indices = @transform_5, window_bounds = array<i64: 99, 64>}, {pipeline_mode = #tpu.pipeline_mode<synchronous>, transform_indices = @transform_6, window_bounds = array<i64: 33, 96>}, {pipeline_mode = #tpu.pipeline_mode<synchronous>, transform_indices = @transform_7, window_bounds = array<i64: 1, 16, 32>}]} {
    %c0 = arith.constant 0 : index
    %c0_0 = arith.constant 0 : index
    %c0_1 = arith.constant 0 : index
    %0 = vector.load %arg1[%c0, %c0_0, %c0_1] : memref<1x16x32xf32, #tpu.memory_space<vmem>>, vector<1x16x32xf32>
    %1 = vector.shape_cast %0 : vector<1x16x32xf32> to vector<16x32xf32>
    %c0_2 = arith.constant 0 : index
    %c0_3 = arith.constant 0 : index
    %c0_4 = arith.constant 0 : index
    %2 = vector.load %arg2[%c0_2, %c0_3, %c0_4] : memref<1x1x16xf32, #tpu.memory_space<vmem>>, vector<1x1x16xf32>
    %3 = vector.shape_cast %2 : vector<1x1x16xf32> to vector<1x16xf32>
    %cst = arith.constant dense<0.000000e+00> : vector<16xf32>
    %4 = vector.multi_reduction <add>, %1, %cst [1] : vector<16x32xf32> to vector<16xf32>
    %5 = vector.shape_cast %4 : vector<16xf32> to vector<16x1xf32>
    %cst_5 = arith.constant 3.200000e+01 : f32
    %6 = vector.broadcast %cst_5 : f32 to vector<16x1xf32>
    %7 = arith.divf %5, %6 : vector<16x1xf32>
    %8 = arith.mulf %1, %1 : vector<16x32xf32>
    %cst_6 = arith.constant dense<0.000000e+00> : vector<16xf32>
    %9 = vector.multi_reduction <add>, %8, %cst_6 [1] : vector<16x32xf32> to vector<16xf32>
    %10 = vector.shape_cast %9 : vector<16xf32> to vector<16x1xf32>
    %cst_7 = arith.constant 3.200000e+01 : f32
    %11 = vector.broadcast %cst_7 : f32 to vector<16x1xf32>
    %12 = arith.divf %10, %11 : vector<16x1xf32>
    %13 = arith.mulf %7, %7 : vector<16x1xf32>
    %14 = arith.subf %12, %13 : vector<16x1xf32>
    %cst_8 = arith.constant 0.000000e+00 : f32
    %15 = vector.broadcast %cst_8 : f32 to vector<16x1xf32>
    %16 = arith.maximumf %14, %15 : vector<16x1xf32>
    %17 = vector.broadcast %7 : vector<16x1xf32> to vector<16x32xf32>
    %18 = arith.subf %1, %17 : vector<16x32xf32>
    %cst_9 = arith.constant 9.99999996E-13 : f32
    %19 = vector.broadcast %cst_9 : f32 to vector<16x1xf32>
    %20 = arith.addf %16, %19 : vector<16x1xf32>
    %21 = math.rsqrt %20 : vector<16x1xf32>
    %22 = vector.broadcast %21 : vector<16x1xf32> to vector<16x32xf32>
    %23 = arith.mulf %18, %22 : vector<16x32xf32>
    %24 = arith.truncf %23 : vector<16x32xf32> to vector<16x32xbf16>
    %c0_10 = arith.constant 0 : index
    %c0_11 = arith.constant 0 : index
    %25 = vector.load %arg6[%c0_10, %c0_11] : memref<99x64xbf16, #tpu.memory_space<vmem>>, vector<32x64xbf16>
    %cst_12 = arith.constant dense<0.000000e+00> : vector<16x64xf32>
    %26 = tpu.matmul %24, %25, %cst_12 {dimension_numbers = #tpu.dot_dimension_numbers<[1], [0], [0], [1], [0, 0, 1, 1], [], []>} : vector<16x32xbf16>, vector<32x64xbf16>, vector<16x64xf32> -> vector<16x64xf32>
    %c96 = arith.constant 96 : index
    %c0_13 = arith.constant 0 : index
    %27 = vector.load %arg6[%c96, %c0_13] : memref<99x64xbf16, #tpu.memory_space<vmem>>, vector<1x64xbf16>
    %28 = arith.extf %27 : vector<1x64xbf16> to vector<1x64xf32>
    %29 = vector.broadcast %28 : vector<1x64xf32> to vector<16x64xf32>
    %30 = arith.addf %26, %29 : vector<16x64xf32>
    %31 = arith.negf %30 : vector<16x64xf32>
    %32 = math.exp %31 : vector<16x64xf32>
    %cst_14 = arith.constant 1.000000e+00 : f32
    %33 = vector.broadcast %cst_14 : f32 to vector<16x64xf32>
    %34 = arith.addf %33, %32 : vector<16x64xf32>
    %35 = arith.divf %33, %34 : vector<16x64xf32>
    %36 = arith.mulf %30, %35 : vector<16x64xf32>
    %37 = arith.truncf %36 : vector<16x64xf32> to vector<16x64xbf16>
    %c0_15 = arith.constant 0 : index
    %c0_16 = arith.constant 0 : index
    %38 = vector.load %arg5[%c0_15, %c0_16] : memref<192x32xbf16, #tpu.memory_space<vmem>>, vector<64x32xbf16>
    %cst_17 = arith.constant dense<0.000000e+00> : vector<16x32xf32>
    %39 = tpu.matmul %37, %38, %cst_17 {dimension_numbers = #tpu.dot_dimension_numbers<[1], [0], [0], [1], [0, 0, 1, 1], [], []>} : vector<16x64xbf16>, vector<64x32xbf16>, vector<16x32xf32> -> vector<16x32xf32>
    %c7 = arith.constant 7 : index
    %c0_18 = arith.constant 0 : index
    %40 = vector.load %arg3[%c7, %c0_18] : memref<185x32xf32, #tpu.memory_space<vmem>>, vector<1x32xf32>
    %41 = vector.broadcast %40 : vector<1x32xf32> to vector<16x32xf32>
    %42 = arith.addf %39, %41 : vector<16x32xf32>
    %cst_19 = arith.constant 5.000000e-01 : f32
    %43 = vector.broadcast %cst_19 : f32 to vector<16x32xf32>
    %44 = arith.mulf %43, %42 : vector<16x32xf32>
    %45 = arith.addf %1, %44 : vector<16x32xf32>
    %cst_20 = arith.constant dense<0.000000e+00> : vector<16xf32>
    %46 = vector.multi_reduction <add>, %45, %cst_20 [1] : vector<16x32xf32> to vector<16xf32>
    %47 = vector.shape_cast %46 : vector<16xf32> to vector<16x1xf32>
    %cst_21 = arith.constant 3.200000e+01 : f32
    %48 = vector.broadcast %cst_21 : f32 to vector<16x1xf32>
    %49 = arith.divf %47, %48 : vector<16x1xf32>
    %50 = arith.mulf %45, %45 : vector<16x32xf32>
    %cst_22 = arith.constant dense<0.000000e+00> : vector<16xf32>
    %51 = vector.multi_reduction <add>, %50, %cst_22 [1] : vector<16x32xf32> to vector<16xf32>
    %52 = vector.shape_cast %51 : vector<16xf32> to vector<16x1xf32>
    %cst_23 = arith.constant 3.200000e+01 : f32
    %53 = vector.broadcast %cst_23 : f32 to vector<16x1xf32>
    %54 = arith.divf %52, %53 : vector<16x1xf32>
    %55 = arith.mulf %49, %49 : vector<16x1xf32>
    %56 = arith.subf %54, %55 : vector<16x1xf32>
    %cst_24 = arith.constant 0.000000e+00 : f32
    %57 = vector.broadcast %cst_24 : f32 to vector<16x1xf32>
    %58 = arith.maximumf %56, %57 : vector<16x1xf32>
    %59 = vector.broadcast %49 : vector<16x1xf32> to vector<16x32xf32>
    %60 = arith.subf %45, %59 : vector<16x32xf32>
    %cst_25 = arith.constant 9.99999996E-13 : f32
    %61 = vector.broadcast %cst_25 : f32 to vector<16x1xf32>
    %62 = arith.addf %58, %61 : vector<16x1xf32>
    %63 = math.rsqrt %62 : vector<16x1xf32>
    %64 = vector.broadcast %63 : vector<16x1xf32> to vector<16x32xf32>
    %65 = arith.mulf %60, %64 : vector<16x32xf32>
    %66 = arith.truncf %65 : vector<16x32xf32> to vector<16x32xbf16>
    %c0_26 = arith.constant 0 : index
    %c0_27 = arith.constant 0 : index
    %67 = vector.load %arg7[%c0_26, %c0_27] : memref<33x96xbf16, #tpu.memory_space<vmem>>, vector<32x96xbf16>
    %cst_28 = arith.constant dense<0.000000e+00> : vector<16x96xf32>
    %68 = tpu.matmul %66, %67, %cst_28 {dimension_numbers = #tpu.dot_dimension_numbers<[1], [0], [0], [1], [0, 0, 1, 1], [], []>} : vector<16x32xbf16>, vector<32x96xbf16>, vector<16x96xf32> -> vector<16x96xf32>
    %c32 = arith.constant 32 : index
    %c0_29 = arith.constant 0 : index
    %69 = vector.load %arg7[%c32, %c0_29] : memref<33x96xbf16, #tpu.memory_space<vmem>>, vector<1x96xbf16>
    %70 = arith.extf %69 : vector<1x96xbf16> to vector<1x96xf32>
    %71 = vector.broadcast %70 : vector<1x96xf32> to vector<16x96xf32>
    %72 = arith.addf %68, %71 : vector<16x96xf32>
    %73 = vector.extract_strided_slice %72 {offsets = [0, 0], sizes = [16, 32], strides = [1, 1]} : vector<16x96xf32> to vector<16x32xf32>
    %74 = vector.extract_strided_slice %72 {offsets = [0, 32], sizes = [16, 32], strides = [1, 1]} : vector<16x96xf32> to vector<16x32xf32>
    %75 = vector.extract_strided_slice %72 {offsets = [0, 64], sizes = [16, 32], strides = [1, 1]} : vector<16x96xf32> to vector<16x32xf32>
    %c121 = arith.constant 121 : index
    %c0_30 = arith.constant 0 : index
    %76 = vector.load %arg3[%c121, %c0_30] : memref<185x32xf32, #tpu.memory_space<vmem>>, vector<64x32xf32>
    %77 = tpu.concatenate %74, %74, %74, %74 in 0 : vector<16x32xf32>, vector<16x32xf32>, vector<16x32xf32>, vector<16x32xf32> -> vector<64x32xf32>
    %78 = arith.mulf %77, %76 : vector<64x32xf32>
    %79 = tpu.concatenate %75, %75, %75, %75 in 0 : vector<16x32xf32>, vector<16x32xf32>, vector<16x32xf32>, vector<16x32xf32> -> vector<64x32xf32>
    %80 = arith.mulf %79, %76 : vector<64x32xf32>
    "tpu.trace_start"() <{level = 10 : i32, message = "td,sd->ts"}> : () -> ()
    %cst_31 = arith.constant dense<0.000000e+00> : vector<16x64xf32>
    %81 = tpu.matmul %73, %78, %cst_31 {dimension_numbers = #tpu.dot_dimension_numbers<[1], [1], [0], [0], [0, 0, 1, 0], [], []>} : vector<16x32xf32>, vector<64x32xf32>, vector<16x64xf32> -> vector<16x64xf32>
    "tpu.trace_stop"() : () -> ()
    %c64 = arith.constant 64 : index
    %c0_32 = arith.constant 0 : index
    %82 = vector.load %arg4[%c64, %c0_32] : memref<80x64xf32, #tpu.memory_space<vmem>>, vector<16x64xf32>
    %83 = tpu.concatenate %3, %3, %3, %3 in 1 : vector<1x16xf32>, vector<1x16xf32>, vector<1x16xf32>, vector<1x16xf32> -> vector<1x64xf32>
    %cst_33 = arith.constant 1.000000e+00 : f32
    %84 = vector.broadcast %cst_33 : f32 to vector<1x64xf32>
    %85 = arith.subf %83, %84 : vector<1x64xf32>
    %cst_34 = arith.constant 1.000000e+09 : f32
    %86 = vector.broadcast %cst_34 : f32 to vector<1x64xf32>
    %87 = arith.mulf %85, %86 : vector<1x64xf32>
    %88 = arith.addf %81, %82 : vector<16x64xf32>
    %89 = vector.broadcast %87 : vector<1x64xf32> to vector<16x64xf32>
    %90 = arith.addf %88, %89 : vector<16x64xf32>
    %cst_35 = arith.constant dense<0xFF800000> : vector<16xf32>
    %91 = vector.multi_reduction <maximumf>, %90, %cst_35 [1] : vector<16x64xf32> to vector<16xf32>
    %92 = vector.shape_cast %91 : vector<16xf32> to vector<16x1xf32>
    %93 = vector.broadcast %92 : vector<16x1xf32> to vector<16x64xf32>
    %94 = arith.subf %90, %93 : vector<16x64xf32>
    %95 = math.exp %94 : vector<16x64xf32>
    %c0_36 = arith.constant 0 : index
    %c0_37 = arith.constant 0 : index
    %96 = vector.load %arg4[%c0_36, %c0_37] : memref<80x64xf32, #tpu.memory_space<vmem>>, vector<64x64xf32>
    %cst_38 = arith.constant dense<0.000000e+00> : vector<16x64xf32>
    %97 = tpu.matmul %95, %96, %cst_38 {dimension_numbers = #tpu.dot_dimension_numbers<[1], [0], [0], [1], [0, 0, 1, 1], [], []>} : vector<16x64xf32>, vector<64x64xf32>, vector<16x64xf32> -> vector<16x64xf32>
    %cst_39 = arith.constant 1.000000e-30 : f32
    %98 = vector.broadcast %cst_39 : f32 to vector<16x64xf32>
    %99 = arith.maximumf %97, %98 : vector<16x64xf32>
    %100 = tpu.reciprocal %99 {approx = true} : vector<16x64xf32> -> vector<16x64xf32>
    %101 = arith.mulf %95, %100 : vector<16x64xf32>
    %cst_40 = arith.constant dense<0.000000e+00> : vector<16x32xf32>
    %102 = tpu.matmul %101, %80, %cst_40 {dimension_numbers = #tpu.dot_dimension_numbers<[1], [0], [0], [1], [0, 0, 1, 1], [], []>} : vector<16x64xf32>, vector<64x32xf32>, vector<16x32xf32> -> vector<16x32xf32>
    %103 = arith.truncf %102 : vector<16x32xf32> to vector<16x32xbf16>
    %c128 = arith.constant 128 : index
    %c0_41 = arith.constant 0 : index
    %104 = vector.load %arg5[%c128, %c0_41] : memref<192x32xbf16, #tpu.memory_space<vmem>>, vector<32x32xbf16>
    %cst_42 = arith.constant dense<0.000000e+00> : vector<16x32xf32>
    %105 = tpu.matmul %103, %104, %cst_42 {dimension_numbers = #tpu.dot_dimension_numbers<[1], [0], [0], [1], [0, 0, 1, 1], [], []>} : vector<16x32xbf16>, vector<32x32xbf16>, vector<16x32xf32> -> vector<16x32xf32>
    %c2 = arith.constant 2 : index
    %c0_43 = arith.constant 0 : index
    %106 = vector.load %arg3[%c2, %c0_43] : memref<185x32xf32, #tpu.memory_space<vmem>>, vector<1x32xf32>
    %107 = vector.broadcast %106 : vector<1x32xf32> to vector<16x32xf32>
    %108 = arith.addf %105, %107 : vector<16x32xf32>
    %109 = arith.addf %45, %108 : vector<16x32xf32>
    %cst_44 = arith.constant dense<0.000000e+00> : vector<16xf32>
    %110 = vector.multi_reduction <add>, %109, %cst_44 [1] : vector<16x32xf32> to vector<16xf32>
    %111 = vector.shape_cast %110 : vector<16xf32> to vector<16x1xf32>
    %cst_45 = arith.constant 3.200000e+01 : f32
    %112 = vector.broadcast %cst_45 : f32 to vector<16x1xf32>
    %113 = arith.divf %111, %112 : vector<16x1xf32>
    %114 = arith.mulf %109, %109 : vector<16x32xf32>
    %cst_46 = arith.constant dense<0.000000e+00> : vector<16xf32>
    %115 = vector.multi_reduction <add>, %114, %cst_46 [1] : vector<16x32xf32> to vector<16xf32>
    %116 = vector.shape_cast %115 : vector<16xf32> to vector<16x1xf32>
    %cst_47 = arith.constant 3.200000e+01 : f32
    %117 = vector.broadcast %cst_47 : f32 to vector<16x1xf32>
    %118 = arith.divf %116, %117 : vector<16x1xf32>
    %119 = arith.mulf %113, %113 : vector<16x1xf32>
    %120 = arith.subf %118, %119 : vector<16x1xf32>
    %cst_48 = arith.constant 0.000000e+00 : f32
    %121 = vector.broadcast %cst_48 : f32 to vector<16x1xf32>
    %122 = arith.maximumf %120, %121 : vector<16x1xf32>
    %123 = vector.broadcast %113 : vector<16x1xf32> to vector<16x32xf32>
    %124 = arith.subf %109, %123 : vector<16x32xf32>
    %cst_49 = arith.constant 9.99999996E-13 : f32
    %125 = vector.broadcast %cst_49 : f32 to vector<16x1xf32>
    %126 = arith.addf %122, %125 : vector<16x1xf32>
    %127 = math.rsqrt %126 : vector<16x1xf32>
    %128 = vector.broadcast %127 : vector<16x1xf32> to vector<16x32xf32>
    %129 = arith.mulf %124, %128 : vector<16x32xf32>
    %130 = arith.truncf %129 : vector<16x32xf32> to vector<16x32xbf16>
    %c64_50 = arith.constant 64 : index
    %c0_51 = arith.constant 0 : index
    %131 = vector.load %arg6[%c64_50, %c0_51] : memref<99x64xbf16, #tpu.memory_space<vmem>>, vector<32x64xbf16>
    %cst_52 = arith.constant dense<0.000000e+00> : vector<16x64xf32>
    %132 = tpu.matmul %130, %131, %cst_52 {dimension_numbers = #tpu.dot_dimension_numbers<[1], [0], [0], [1], [0, 0, 1, 1], [], []>} : vector<16x32xbf16>, vector<32x64xbf16>, vector<16x64xf32> -> vector<16x64xf32>
    %c98 = arith.constant 98 : index
    %c0_53 = arith.constant 0 : index
    %133 = vector.load %arg6[%c98, %c0_53] : memref<99x64xbf16, #tpu.memory_space<vmem>>, vector<1x64xbf16>
    %134 = arith.extf %133 : vector<1x64xbf16> to vector<1x64xf32>
    %135 = vector.broadcast %134 : vector<1x64xf32> to vector<16x64xf32>
    %136 = arith.addf %132, %135 : vector<16x64xf32>
    %137 = vector.extract_strided_slice %136 {offsets = [0, 0], sizes = [16, 32], strides = [1, 1]} : vector<16x64xf32> to vector<16x32xf32>
    %138 = vector.extract_strided_slice %136 {offsets = [0, 32], sizes = [16, 32], strides = [1, 1]} : vector<16x64xf32> to vector<16x32xf32>
    %139 = arith.negf %138 : vector<16x32xf32>
    %140 = math.exp %139 : vector<16x32xf32>
    %cst_54 = arith.constant 1.000000e+00 : f32
    %141 = vector.broadcast %cst_54 : f32 to vector<16x32xf32>
    %142 = arith.addf %141, %140 : vector<16x32xf32>
    %143 = arith.divf %141, %142 : vector<16x32xf32>
    %144 = arith.mulf %137, %143 : vector<16x32xf32>
    %cst_55 = arith.constant 0.000000e+00 : f32
    %145 = vector.broadcast %cst_55 : f32 to vector<16x32xf32>
    %c3_i32 = arith.constant 3 : i32
    %146 = tpu.dynamic_rotate %144 by %c3_i32 dim 0 : vector<16x32xf32>, i32 -> vector<16x32xf32>
    %c9 = arith.constant 9 : index
    %c0_56 = arith.constant 0 : index
    %147 = vector.load %arg3[%c9, %c0_56] : memref<185x32xf32, #tpu.memory_space<vmem>>, vector<16x32xf32>
    %148 = arith.mulf %146, %147 : vector<16x32xf32>
    %149 = arith.addf %145, %148 : vector<16x32xf32>
    %c2_i32 = arith.constant 2 : i32
    %150 = tpu.dynamic_rotate %144 by %c2_i32 dim 0 : vector<16x32xf32>, i32 -> vector<16x32xf32>
    %c25 = arith.constant 25 : index
    %c0_57 = arith.constant 0 : index
    %151 = vector.load %arg3[%c25, %c0_57] : memref<185x32xf32, #tpu.memory_space<vmem>>, vector<16x32xf32>
    %152 = arith.mulf %150, %151 : vector<16x32xf32>
    %153 = arith.addf %149, %152 : vector<16x32xf32>
    %c1_i32 = arith.constant 1 : i32
    %154 = tpu.dynamic_rotate %144 by %c1_i32 dim 0 : vector<16x32xf32>, i32 -> vector<16x32xf32>
    %c41 = arith.constant 41 : index
    %c0_58 = arith.constant 0 : index
    %155 = vector.load %arg3[%c41, %c0_58] : memref<185x32xf32, #tpu.memory_space<vmem>>, vector<16x32xf32>
    %156 = arith.mulf %154, %155 : vector<16x32xf32>
    %157 = arith.addf %153, %156 : vector<16x32xf32>
    %c57 = arith.constant 57 : index
    %c0_59 = arith.constant 0 : index
    %158 = vector.load %arg3[%c57, %c0_59] : memref<185x32xf32, #tpu.memory_space<vmem>>, vector<16x32xf32>
    %159 = arith.mulf %144, %158 : vector<16x32xf32>
    %160 = arith.addf %157, %159 : vector<16x32xf32>
    %c15_i32 = arith.constant 15 : i32
    %161 = tpu.dynamic_rotate %144 by %c15_i32 dim 0 : vector<16x32xf32>, i32 -> vector<16x32xf32>
    %c73 = arith.constant 73 : index
    %c0_60 = arith.constant 0 : index
    %162 = vector.load %arg3[%c73, %c0_60] : memref<185x32xf32, #tpu.memory_space<vmem>>, vector<16x32xf32>
    %163 = arith.mulf %161, %162 : vector<16x32xf32>
    %164 = arith.addf %160, %163 : vector<16x32xf32>
    %c14_i32 = arith.constant 14 : i32
    %165 = tpu.dynamic_rotate %144 by %c14_i32 dim 0 : vector<16x32xf32>, i32 -> vector<16x32xf32>
    %c89 = arith.constant 89 : index
    %c0_61 = arith.constant 0 : index
    %166 = vector.load %arg3[%c89, %c0_61] : memref<185x32xf32, #tpu.memory_space<vmem>>, vector<16x32xf32>
    %167 = arith.mulf %165, %166 : vector<16x32xf32>
    %168 = arith.addf %164, %167 : vector<16x32xf32>
    %c13_i32 = arith.constant 13 : i32
    %169 = tpu.dynamic_rotate %144 by %c13_i32 dim 0 : vector<16x32xf32>, i32 -> vector<16x32xf32>
    %c105 = arith.constant 105 : index
    %c0_62 = arith.constant 0 : index
    %170 = vector.load %arg3[%c105, %c0_62] : memref<185x32xf32, #tpu.memory_space<vmem>>, vector<16x32xf32>
    %171 = arith.mulf %169, %170 : vector<16x32xf32>
    %172 = arith.addf %168, %171 : vector<16x32xf32>
    %c3 = arith.constant 3 : index
    %c0_63 = arith.constant 0 : index
    %173 = vector.load %arg3[%c3, %c0_63] : memref<185x32xf32, #tpu.memory_space<vmem>>, vector<1x32xf32>
    %174 = vector.broadcast %173 : vector<1x32xf32> to vector<16x32xf32>
    %175 = arith.addf %172, %174 : vector<16x32xf32>
    %c4 = arith.constant 4 : index
    %c0_64 = arith.constant 0 : index
    %176 = vector.load %arg3[%c4, %c0_64] : memref<185x32xf32, #tpu.memory_space<vmem>>, vector<1x32xf32>
    %177 = vector.broadcast %176 : vector<1x32xf32> to vector<16x32xf32>
    %178 = arith.mulf %175, %177 : vector<16x32xf32>
    %c5 = arith.constant 5 : index
    %c0_65 = arith.constant 0 : index
    %179 = vector.load %arg3[%c5, %c0_65] : memref<185x32xf32, #tpu.memory_space<vmem>>, vector<1x32xf32>
    %180 = vector.broadcast %179 : vector<1x32xf32> to vector<16x32xf32>
    %181 = arith.addf %178, %180 : vector<16x32xf32>
    %182 = arith.negf %181 : vector<16x32xf32>
    %183 = math.exp %182 : vector<16x32xf32>
    %cst_66 = arith.constant 1.000000e+00 : f32
    %184 = vector.broadcast %cst_66 : f32 to vector<16x32xf32>
    %185 = arith.addf %184, %183 : vector<16x32xf32>
    %186 = arith.divf %184, %185 : vector<16x32xf32>
    %187 = arith.mulf %181, %186 : vector<16x32xf32>
    %188 = arith.truncf %187 : vector<16x32xf32> to vector<16x32xbf16>
    %c160 = arith.constant 160 : index
    %c0_67 = arith.constant 0 : index
    %189 = vector.load %arg5[%c160, %c0_67] : memref<192x32xbf16, #tpu.memory_space<vmem>>, vector<32x32xbf16>
    %cst_68 = arith.constant dense<0.000000e+00> : vector<16x32xf32>
    %190 = tpu.matmul %188, %189, %cst_68 {dimension_numbers = #tpu.dot_dimension_numbers<[1], [0], [0], [1], [0, 0, 1, 1], [], []>} : vector<16x32xbf16>, vector<32x32xbf16>, vector<16x32xf32> -> vector<16x32xf32>
    %c6 = arith.constant 6 : index
    %c0_69 = arith.constant 0 : index
    %191 = vector.load %arg3[%c6, %c0_69] : memref<185x32xf32, #tpu.memory_space<vmem>>, vector<1x32xf32>
    %192 = vector.broadcast %191 : vector<1x32xf32> to vector<16x32xf32>
    %193 = arith.addf %190, %192 : vector<16x32xf32>
    %194 = arith.addf %109, %193 : vector<16x32xf32>
    %cst_70 = arith.constant dense<0.000000e+00> : vector<16xf32>
    %195 = vector.multi_reduction <add>, %194, %cst_70 [1] : vector<16x32xf32> to vector<16xf32>
    %196 = vector.shape_cast %195 : vector<16xf32> to vector<16x1xf32>
    %cst_71 = arith.constant 3.200000e+01 : f32
    %197 = vector.broadcast %cst_71 : f32 to vector<16x1xf32>
    %198 = arith.divf %196, %197 : vector<16x1xf32>
    %199 = arith.mulf %194, %194 : vector<16x32xf32>
    %cst_72 = arith.constant dense<0.000000e+00> : vector<16xf32>
    %200 = vector.multi_reduction <add>, %199, %cst_72 [1] : vector<16x32xf32> to vector<16xf32>
    %201 = vector.shape_cast %200 : vector<16xf32> to vector<16x1xf32>
    %cst_73 = arith.constant 3.200000e+01 : f32
    %202 = vector.broadcast %cst_73 : f32 to vector<16x1xf32>
    %203 = arith.divf %201, %202 : vector<16x1xf32>
    %204 = arith.mulf %198, %198 : vector<16x1xf32>
    %205 = arith.subf %203, %204 : vector<16x1xf32>
    %cst_74 = arith.constant 0.000000e+00 : f32
    %206 = vector.broadcast %cst_74 : f32 to vector<16x1xf32>
    %207 = arith.maximumf %205, %206 : vector<16x1xf32>
    %208 = vector.broadcast %198 : vector<16x1xf32> to vector<16x32xf32>
    %209 = arith.subf %194, %208 : vector<16x32xf32>
    %cst_75 = arith.constant 9.99999996E-13 : f32
    %210 = vector.broadcast %cst_75 : f32 to vector<16x1xf32>
    %211 = arith.addf %207, %210 : vector<16x1xf32>
    %212 = math.rsqrt %211 : vector<16x1xf32>
    %213 = vector.broadcast %212 : vector<16x1xf32> to vector<16x32xf32>
    %214 = arith.mulf %209, %213 : vector<16x32xf32>
    %215 = arith.truncf %214 : vector<16x32xf32> to vector<16x32xbf16>
    %c32_76 = arith.constant 32 : index
    %c0_77 = arith.constant 0 : index
    %216 = vector.load %arg6[%c32_76, %c0_77] : memref<99x64xbf16, #tpu.memory_space<vmem>>, vector<32x64xbf16>
    %cst_78 = arith.constant dense<0.000000e+00> : vector<16x64xf32>
    %217 = tpu.matmul %215, %216, %cst_78 {dimension_numbers = #tpu.dot_dimension_numbers<[1], [0], [0], [1], [0, 0, 1, 1], [], []>} : vector<16x32xbf16>, vector<32x64xbf16>, vector<16x64xf32> -> vector<16x64xf32>
    %c97 = arith.constant 97 : index
    %c0_79 = arith.constant 0 : index
    %218 = vector.load %arg6[%c97, %c0_79] : memref<99x64xbf16, #tpu.memory_space<vmem>>, vector<1x64xbf16>
    %219 = arith.extf %218 : vector<1x64xbf16> to vector<1x64xf32>
    %220 = vector.broadcast %219 : vector<1x64xf32> to vector<16x64xf32>
    %221 = arith.addf %217, %220 : vector<16x64xf32>
    %222 = arith.negf %221 : vector<16x64xf32>
    %223 = math.exp %222 : vector<16x64xf32>
    %cst_80 = arith.constant 1.000000e+00 : f32
    %224 = vector.broadcast %cst_80 : f32 to vector<16x64xf32>
    %225 = arith.addf %224, %223 : vector<16x64xf32>
    %226 = arith.divf %224, %225 : vector<16x64xf32>
    %227 = arith.mulf %221, %226 : vector<16x64xf32>
    %228 = arith.truncf %227 : vector<16x64xf32> to vector<16x64xbf16>
    %c64_81 = arith.constant 64 : index
    %c0_82 = arith.constant 0 : index
    %229 = vector.load %arg5[%c64_81, %c0_82] : memref<192x32xbf16, #tpu.memory_space<vmem>>, vector<64x32xbf16>
    %cst_83 = arith.constant dense<0.000000e+00> : vector<16x32xf32>
    %230 = tpu.matmul %228, %229, %cst_83 {dimension_numbers = #tpu.dot_dimension_numbers<[1], [0], [0], [1], [0, 0, 1, 1], [], []>} : vector<16x64xbf16>, vector<64x32xbf16>, vector<16x32xf32> -> vector<16x32xf32>
    %c8 = arith.constant 8 : index
    %c0_84 = arith.constant 0 : index
    %231 = vector.load %arg3[%c8, %c0_84] : memref<185x32xf32, #tpu.memory_space<vmem>>, vector<1x32xf32>
    %232 = vector.broadcast %231 : vector<1x32xf32> to vector<16x32xf32>
    %233 = arith.addf %230, %232 : vector<16x32xf32>
    %cst_85 = arith.constant 5.000000e-01 : f32
    %234 = vector.broadcast %cst_85 : f32 to vector<16x32xf32>
    %235 = arith.mulf %234, %233 : vector<16x32xf32>
    %236 = arith.addf %194, %235 : vector<16x32xf32>
    %cst_86 = arith.constant dense<0.000000e+00> : vector<16xf32>
    %237 = vector.multi_reduction <add>, %236, %cst_86 [1] : vector<16x32xf32> to vector<16xf32>
    %238 = vector.shape_cast %237 : vector<16xf32> to vector<16x1xf32>
    %cst_87 = arith.constant 3.200000e+01 : f32
    %239 = vector.broadcast %cst_87 : f32 to vector<16x1xf32>
    %240 = arith.divf %238, %239 : vector<16x1xf32>
    %241 = arith.mulf %236, %236 : vector<16x32xf32>
    %cst_88 = arith.constant dense<0.000000e+00> : vector<16xf32>
    %242 = vector.multi_reduction <add>, %241, %cst_88 [1] : vector<16x32xf32> to vector<16xf32>
    %243 = vector.shape_cast %242 : vector<16xf32> to vector<16x1xf32>
    %cst_89 = arith.constant 3.200000e+01 : f32
    %244 = vector.broadcast %cst_89 : f32 to vector<16x1xf32>
    %245 = arith.divf %243, %244 : vector<16x1xf32>
    %246 = arith.mulf %240, %240 : vector<16x1xf32>
    %247 = arith.subf %245, %246 : vector<16x1xf32>
    %cst_90 = arith.constant 0.000000e+00 : f32
    %248 = vector.broadcast %cst_90 : f32 to vector<16x1xf32>
    %249 = arith.maximumf %247, %248 : vector<16x1xf32>
    %250 = vector.broadcast %240 : vector<16x1xf32> to vector<16x32xf32>
    %251 = arith.subf %236, %250 : vector<16x32xf32>
    %cst_91 = arith.constant 9.99999996E-13 : f32
    %252 = vector.broadcast %cst_91 : f32 to vector<16x1xf32>
    %253 = arith.addf %249, %252 : vector<16x1xf32>
    %254 = math.rsqrt %253 : vector<16x1xf32>
    %255 = vector.broadcast %254 : vector<16x1xf32> to vector<16x32xf32>
    %256 = arith.mulf %251, %255 : vector<16x32xf32>
    %c0_92 = arith.constant 0 : index
    %c0_93 = arith.constant 0 : index
    %257 = vector.load %arg3[%c0_92, %c0_93] : memref<185x32xf32, #tpu.memory_space<vmem>>, vector<1x32xf32>
    %258 = vector.broadcast %257 : vector<1x32xf32> to vector<16x32xf32>
    %259 = arith.mulf %256, %258 : vector<16x32xf32>
    %c1 = arith.constant 1 : index
    %c0_94 = arith.constant 0 : index
    %260 = vector.load %arg3[%c1, %c0_94] : memref<185x32xf32, #tpu.memory_space<vmem>>, vector<1x32xf32>
    %261 = vector.broadcast %260 : vector<1x32xf32> to vector<16x32xf32>
    %262 = arith.addf %259, %261 : vector<16x32xf32>
    %c0_95 = arith.constant 0 : index
    %c0_96 = arith.constant 0 : index
    %c0_97 = arith.constant 0 : index
    %263 = vector.load %arg8[%c0_95, %c0_96, %c0_97] : memref<1x16x32xf32, #tpu.memory_space<vmem>>, vector<1x16x32xf32>
    %264 = vector.shape_cast %263 : vector<1x16x32xf32> to vector<16x32xf32>
    %265 = vector.shape_cast %262 : vector<16x32xf32> to vector<1x16x32xf32>
    tpu.vector_store %arg8[%c0_95, %c0_96, %c0_97], %265 {strides = array<i32>} : memref<1x16x32xf32, #tpu.memory_space<vmem>>, vector<1x16x32xf32>,
    return
  }
  func.func @transform_0(%arg0: i32) -> (i32, i32, i32) {
    %c0_i32 = arith.constant 0 : i32
    %c0_i32_0 = arith.constant 0 : i32
    %c0_i32_1 = arith.constant 0 : i32
    %c0_i32_2 = arith.constant 0 : i32
    return %c0_i32, %c0_i32_0, %c0_i32_1 : i32, i32, i32
  }
  func.func @transform_1(%arg0: i32) -> (i32, i32, i32) {
    %c0_i32 = arith.constant 0 : i32
    %c0_i32_0 = arith.constant 0 : i32
    %c0_i32_1 = arith.constant 0 : i32
    %c0_i32_2 = arith.constant 0 : i32
    return %c0_i32, %c0_i32_0, %c0_i32_1 : i32, i32, i32
  }
  func.func @transform_2(%arg0: i32) -> (i32, i32) {
    %c0_i32 = arith.constant 0 : i32
    %c0_i32_0 = arith.constant 0 : i32
    %c0_i32_1 = arith.constant 0 : i32
    return %c0_i32, %c0_i32_0 : i32, i32
  }
  func.func @transform_3(%arg0: i32) -> (i32, i32) {
    %c0_i32 = arith.constant 0 : i32
    %c0_i32_0 = arith.constant 0 : i32
    %c0_i32_1 = arith.constant 0 : i32
    return %c0_i32, %c0_i32_0 : i32, i32
  }
  func.func @transform_4(%arg0: i32) -> (i32, i32) {
    %c0_i32 = arith.constant 0 : i32
    %c0_i32_0 = arith.constant 0 : i32
    %c0_i32_1 = arith.constant 0 : i32
    return %c0_i32, %c0_i32_0 : i32, i32
  }
  func.func @transform_5(%arg0: i32) -> (i32, i32) {
    %c0_i32 = arith.constant 0 : i32
    %c0_i32_0 = arith.constant 0 : i32
    %c0_i32_1 = arith.constant 0 : i32
    return %c0_i32, %c0_i32_0 : i32, i32
  }
  func.func @transform_6(%arg0: i32) -> (i32, i32) {
    %c0_i32 = arith.constant 0 : i32
    %c0_i32_0 = arith.constant 0 : i32
    %c0_i32_1 = arith.constant 0 : i32
    return %c0_i32, %c0_i32_0 : i32, i32
  }
  func.func @transform_7(%arg0: i32) -> (i32, i32, i32) {
    %c0_i32 = arith.constant 0 : i32
    %c0_i32_0 = arith.constant 0 : i32
    %c0_i32_1 = arith.constant 0 : i32
    %c0_i32_2 = arith.constant 0 : i32
    return %c0_i32, %c0_i32_0, %c0_i32_1 : i32, i32, i32
  }
}

</mosaic_0001>

<bundles_post_ra>
// kernel: encoder_layer.1
= control target key start
LH: loop header
LB: loop body
LE: loop exit
PB: predicated region body
PF: predicated region fallthrough
CT: control target
= control target key end

     0   :  { %vm31_vm0 = vcmask 261120   ;;  %s2409_s0 = inlined_call_operand.vmem [shape: f32[1,16,32], index: 0, kind: input, shape index: {}]   ;;  %s2410_s1 = inlined_call_operand.vmem [shape: f32[1,1,16], index: 1, kind: input, shape index: {}]   ;;  %s2411_s2 = inlined_call_operand.vmem [shape: f32[185,32], index: 2, kind: input, shape index: {}]   ;;  %s2412_s3 = inlined_call_operand.vmem [shape: f32[80,64], index: 3, kind: input, shape index: {}]   ;;  %s2413_s4 = inlined_call_operand.vmem [shape: bf16[192,32], index: 4, kind: input, shape index: {}]   ;;  %s2414_s5 = inlined_call_operand.vmem [shape: bf16[99,64], index: 5, kind: input, shape index: {}]   ;;  %s2415_s6 = inlined_call_operand.vmem [shape: bf16[33,96], index: 6, kind: input, shape index: {}]   ;;  %s2416_s7 = inlined_call_operand.hbm [shape: f32[1,16,32], index: 7, kind: output, shape index: {}]  }
   0x1   :  { %v1921_v0 = vld [vmem:[%s2409_s0] sm:$0xff]  ;;  %v1926_v1 = vld [vmem:[%s2409_s0 + $0x8] sm:$0xff] }
   0x2   :  { %v32_v2 = vsel %vm31_vm0, %v1921_v0, 0.0  ;;  %v41_v3 = vmul.f32 %v1921_v0, %v1921_v0  ;;  %v35_v4 = vsel %vm31_vm0, %v1926_v1, 0.0  ;;  %v42_v5 = vmul.f32 %v1926_v1, %v1926_v1 }
   0x3   :  { %33 = vadd.xlane.f32.xlu0 %v32_v2 }
   0x4   :  { %v43_v6 = vsel %vm31_vm0, %v41_v3, 0.0  ;;  %v46_v7 = vsel %vm31_vm0, %v42_v5, 0.0 }
   0x5   :  { %44 = vadd.xlane.f32.xlu1 %v43_v6 }
   0x7   :  { %36 = vadd.xlane.f32.xlu0 %v35_v4 }
   0x9   :  { %47 = vadd.xlane.f32.xlu1 %v46_v7 }
   0xa   :  { %12 = vsyncpa [#allocation3], 0  ;;  %v1764_v8 = vld [vmem:[%s2414_s5] sm:$0xff]   ;;  %v1868_v9 = vmov 0.0   ;;  %vm1869_vm1 = vmmov 0   ;;  %v1765_v10 = vld [vmem:[%s2414_s5 + $0x8] sm:$0xff]   ;;  %v72_v38 = vlaneseq }
   0xb   :  { %1529 = vmatprep.subr.bf16.mxu1 %v1868_v9  ;;  %1533 = vmatprep.mubr.msk.bf16.mxu1 %vm1869_vm1, %v1868_v9  ;;  %v1766_v34 = vld [vmem:[%s2413_s4] sm:$0xff]   ;;  %v1767_v35 = vld [vmem:[%s2413_s4 + $0x8] sm:$0xff]   ;;  %v1768_v36 = vld [vmem:[%s2413_s4 + $0x10] sm:$0xff]   ;;  %vm184_vm2 = vcmask 523264   ;;  %s1870_s0 = smov 32   ;;  %s1872_s21 = smov 16  }
   0xc   :  { %1530 = vmatpush3.bf16.msra.mxu1 %v1764_v8  ;;  %1549 = vmatprep.subr.bf16.mxu0 %v1868_v9  ;;  %v1769_v37 = vld [vmem:[%s2413_s4 + $0x18] sm:$0xff]   ;;  %v1972_v39 = vshrl.u32 %v72_v38, 7  ;;  %v70_v40 = vld [vmem:[%s2414_s5 + $0x30] sm:$0x1]  ;;  %v1416_v61 = vld [vmem:[%s2411_s2 + $0x7] ss:$0 sm:$0xff] }
   0xd   :  { %1531 = vmatprep.subr.bf16.mxu1 %v1868_v9  ;;  %1553 = vmatprep.mubr.msk.bf16.mxu0 %vm1869_vm1, %v1868_v9  ;;  %v71_v41 = vunpack.c.l.bf16 %v70_v40  ;;  %s1873_s22 = smov 48   ;;  %vm2096_vm3 = vmpackc.low %vm31_vm0, %vm31_vm0  ;;  %vm428_vm4 = vcmask 130048   ;;  %vm431_vm5 = vcmask 392192   ;;  %s1874_s10 = smov 64  }
   0xe   :  { %v1978_v42 = vsub.s32 0, %v1972_v39  ;;  %vm975_vm6 = vcmp.lt.s32.totalorder %v1972_v39, 3  ;;  %vm986_vm7 = vcmp.lt.s32.totalorder %v1972_v39, 2  ;;  %vm997_vm8 = vcmp.lt.s32.totalorder %v1972_v39, 1  ;;  %s1875_s9 = smov [#allocation2]  }
   0xf   :  { %vm1014_vm9 = vcmp.lt.s32.totalorder %v1972_v39, 7  ;;  %vm1025_vm10 = vcmp.lt.s32.totalorder %v1972_v39, 6  ;;  %vm1036_vm11 = vcmp.lt.s32.totalorder %v1972_v39, 5 }
  0x10   :  { %1532 = vmatpush3.bf16.msra.mxu1 %v1765_v10  ;;  %v75_v43 = vrot.slane %v71_v41, %v1978_v42 }
  0x11   :  { %1537 = vmatprep.subr.bf16.mxu1 %v1868_v9 }
  0x90   :  { %v34_v11 = vpop.xlane.xlu0 %33 }
  0x91   :  { %v39_v12 = vmul.f32 0.03125, %v34_v11 }
  0x92   :  { %v45_v13 = vpop.xlane.xlu1 %44 }
  0x93   :  { %v51_v14 = vmul.f32 %v39_v12, %v39_v12  ;;  %v49_v15 = vmul.f32 0.03125, %v45_v13  ;;  %v57_v28 = vsub.f32 %v1921_v0, %v39_v12 }
  0x94   :  { %v37_v16 = vpop.xlane.xlu0 %36 }
  0x95   :  { %v53_v17 = vsub.f32 %v49_v15, %v51_v14  ;;  %v40_v18 = vmul.f32 0.03125, %v37_v16  ;;  %v1770_v15 = vld [vmem:[%s2415_s6] sm:$0xff]   ;;  %v1771_v16 = vld [vmem:[%s2415_s6 + $0x8] sm:$0xff]  }
  0x96   :  { %v48_v19 = vpop.xlane.xlu1 %47  ;;  %1550 = vmatpush3.bf16.msra.mxu0 %v1770_v15 }
  0x97   :  { %v55_v20 = vmax.f32 %v53_v17, 0.0  ;;  %v52_v21 = vmul.f32 %v40_v18, %v40_v18  ;;  %v50_v22 = vmul.f32 0.03125, %v48_v19  ;;  %v58_v29 = vsub.f32 %v1926_v1, %v40_v18  ;;  %1551 = vmatprep.subr.bf16.mxu0 %v1868_v9  ;;  %v2011_v17 = vld [vmem:[%s2411_s2 + $0x81] sm:$0xff]  ;;  %v2016_v18 = vld [vmem:[%s2411_s2 + $0x79] sm:$0xff]  ;;  %v2025_v19 = vld [vmem:[%s2411_s2 + $0x89] sm:$0xff] }
  0x99   :  { %v59_v23 = vadd.f32 1e-12, %v55_v20  ;;  %v54_v24 = vsub.f32 %v50_v22, %v52_v21  ;;  %v2030_v20 = vld [vmem:[%s2411_s2 + $0x99] sm:$0xff]  ;;  %v2039_v21 = vld [vmem:[%s2411_s2 + $0x91] sm:$0xff]  ;;  %v2044_v22 = vld [vmem:[%s2411_s2 + $0xa9] sm:$0xff] }
  0x9a   :  { %1552 = vmatpush3.bf16.msra.mxu0 %v1771_v16 }
  0x9b   :  { %v56_v25 = vmax.f32 %v54_v24, 0.0  ;;  %1784 = vrsqrt.f32 %v59_v23  ;;  %v2053_v23 = vld [vmem:[%s2411_s2 + $0xa1] sm:$0xff]  ;;  %v2060_v24 = vld [vmem:[%s2411_s2 + $0xb1] sm:$0xff] }
  0x9d   :  { %v60_v26 = vadd.f32 1e-12, %v56_v25 }
  0x9f   :  { %1786 = vrsqrt.f32 %v60_v26 }
  0xa5   :  { %v1785_v27 = vpop.eup %1784 }
  0xa6   :  { %v63_v31 = vmul.f32 %v1785_v27, %v57_v28 }
  0xa9   :  { %v1787_v30 = vpop.eup %1786 }
  0xaa   :  { %v64_v32 = vmul.f32 %v1787_v30, %v58_v29 }
  0xac   :  { %v65_v33 = vpack.c.bf16 %v64_v32, %v63_v31 }
  0xae   :  { %1534 = vmatmul.mubr.msk.bf16.vlgmr.msra.gmra.mrb[0].mxu1 %vm31_vm0, %v65_v33 }
  0xaf   :  { %1545 = vmatprep.mubr.msk.bf16.mxu1 %vm1869_vm1, %v1868_v9  ;;  %1538 = vmatpush3.bf16.msra.mxu1 %v1766_v34 }
  0xb0   :  { %1539 = vmatprep.subr.bf16.mxu1 %v1868_v9 }
  0xb3   :  { %1540 = vmatpush3.bf16.msra.mxu1 %v1767_v35 }
  0xb4   :  { %1541 = vmatprep.subr.bf16.mxu1 %v1868_v9 }
  0xb7   :  { %1542 = vmatpush3.bf16.msra.mxu1 %v1768_v36 }
  0xb8   :  { %1543 = vmatprep.subr.bf16.mxu1 %v1868_v9 }
  0xbb   :  { %1544 = vmatpush3.bf16.msra.mxu1 %v1769_v37 }
 0x181   :  { %v125_v44 = vpop.f32.mrb[0].mxu1 }
 0x182   :  { %v126_v45 = vadd.f32 %v125_v44, %v75_v43  ;;  %v1535_v46 = vpop.f32.mrb[1].mxu1 }
 0x183   :  { %v128_v47 = vpop.f32.mrb[2].mxu1 }
 0x184   :  { %v1414_v48 = vmul.f32 -1.442695, %v126_v45  ;;  %v129_v49 = vadd.f32 %v128_v47, %v75_v43  ;;  %v1536_v50 = vpop.f32.mrb[3].mxu1 }
 0x186   :  { %1788 = vpow2.f32 %v1414_v48  ;;  %v1415_v51 = vmul.f32 -1.442695, %v129_v49 }
 0x188   :  { %1790 = vpow2.f32 %v1415_v51 }
 0x190   :  { %v1789_v52 = vpop.eup %1788 }
 0x191   :  { %v138_v53 = vadd.f32 1.0, %v1789_v52  ;;  %v270_v52 = vld [vmem:[%s2415_s6 + $0x10] sm:$0x1]  ;;  %s1871_s6 = smov 96  }
 0x192   :  { %v1791_v54 = vpop.eup %1790 }
 0x193   :  { %1792 = vrcp.f32 %v138_v53  ;;  %v139_v55 = vadd.f32 1.0, %v1791_v54  ;;  %v271_v54 = vunpack.c.l.bf16 %v270_v52 }
 0x195   :  { %1794 = vrcp.f32 %v139_v55 }
 0x19d   :  { %v1793_v56 = vpop.eup %1792 }
 0x19e   :  { %v144_v58 = vmul.f32 %v1793_v56, %v126_v45  ;;  %v275_v56 = vrot.slane %v271_v54, %v1978_v42 }
 0x19f   :  { %v1795_v57 = vpop.eup %1794 }
 0x1a0   :  { %v145_v59 = vmul.f32 %v1795_v57, %v129_v49 }
 0x1a2   :  { %v146_v60 = vpack.c.bf16 %v145_v59, %v144_v58 }
 0x1a4   :  { %1546 = vmatmul.mubr.msk.bf16.vlgmr.msra.gmra.mrb[4].mxu1 %vm184_vm2, %v146_v60 }
 0x277   :  { %v222_v62 = vpop.f32.mrb[4].mxu1 }
 0x278   :  { %v223_v63 = vadd.f32 %v1416_v61, %v222_v62  ;;  %v1547_v2 = vpop.f32.mrb[5].mxu1 }
 0x279   :  { %v225_v3 = vpop.f32.mrb[6].mxu1 }
 0x27a   :  { %v229_v4 = vmul.f32 0.5, %v223_v63  ;;  %v226_v5 = vadd.f32 %v1416_v61, %v225_v3  ;;  %v1548_v6 = vpop.f32.mrb[7].mxu1 }
 0x27c   :  { %v1986_v7 = vadd.f32 %v229_v4, %v1921_v0  ;;  %v230_v8 = vmul.f32 0.5, %v226_v5 }
 0x27e   :  { %v1989_v10 = vadd.f32 %v230_v8, %v1926_v1  ;;  %v233_v11 = vsel %vm31_vm0, %v1986_v7, 0.0  ;;  %v241_v12 = vmul.f32 %v1986_v7, %v1986_v7 }
 0x27f   :  { %234 = vadd.xlane.f32.xlu0 %v233_v11 }
 0x280   :  { %v236_v13 = vsel %vm31_vm0, %v1989_v10, 0.0  ;;  %v242_v14 = vmul.f32 %v1989_v10, %v1989_v10  ;;  %v243_v0 = vsel %vm31_vm0, %v241_v12, 0.0 }
 0x281   :  { %237 = vadd.xlane.f32.xlu1 %v236_v13 }
 0x282   :  { %v246_v1 = vsel %vm31_vm0, %v242_v14, 0.0 }
 0x283   :  { %244 = vadd.xlane.f32.xlu0 %v243_v0 }
 0x285   :  { %247 = vadd.xlane.f32.xlu1 %v246_v1 }
 0x296   :  { %350 = vrot.lane.b32.xlu1 %v2011_v17, %s1870_s0 }
 0x299   :  { %348 = vrot.lane.b32.xlu0 %v2016_v18, %s1870_s0 }
 0x29a   :  { %352 = vrot.lane.b32.xlu1 %v2025_v19, %s1870_s0 }
 0x29d   :  { %356 = vrot.lane.b32.xlu0 %v2030_v20, %s1870_s0 }
 0x29e   :  { %354 = vrot.lane.b32.xlu1 %v2039_v21, %s1870_s0 }
 0x2a1   :  { %360 = vrot.lane.b32.xlu0 %v2044_v22, %s1870_s0 }
 0x2a2   :  { %358 = vrot.lane.b32.xlu1 %v2053_v23, %s1870_s0 }
 0x2a6   :  { %362 = vrot.lane.b32.xlu1 %v2060_v24, %s1870_s0 }
 0x30c   :  { %v235_v25 = vpop.xlane.xlu0 %234 }
 0x30d   :  { %v239_v26 = vmul.f32 0.03125, %v235_v25 }
 0x30e   :  { %v238_v27 = vpop.xlane.xlu1 %237 }
 0x30f   :  { %v240_v28 = vmul.f32 0.03125, %v238_v27  ;;  %v251_v30 = vmul.f32 %v239_v26, %v239_v26  ;;  %v257_v44 = vsub.f32 %v1986_v7, %v239_v26  ;;  %v30_v26 = vld [vmem:[%s2410_s1] sm:$0x1] }
 0x310   :  { %v245_v29 = vpop.xlane.xlu0 %244  ;;  %v418_v27 = vrot.slane %v30_v26, %v1978_v42 }
 0x311   :  { %v249_v31 = vmul.f32 0.03125, %v245_v29  ;;  %v252_v33 = vmul.f32 %v240_v28, %v240_v28  ;;  %v258_v45 = vsub.f32 %v1989_v10, %v240_v28 }
 0x312   :  { %v248_v32 = vpop.xlane.xlu1 %247 }
 0x313   :  { %v253_v34 = vsub.f32 %v249_v31, %v251_v30  ;;  %v250_v35 = vmul.f32 0.03125, %v248_v32 }
 0x314   :  { %v349_v55 = vpop.permute.xlu0 %348 }
 0x315   :  { %v255_v36 = vmax.f32 %v253_v34, 0.0  ;;  %v254_v37 = vsub.f32 %v250_v35, %v252_v33 }
 0x316   :  { %v351_v50 = vpop.permute.xlu1 %350 }
 0x317   :  { %v259_v38 = vadd.f32 1e-12, %v255_v36  ;;  %v256_v40 = vmax.f32 %v254_v37, 0.0 }
 0x318   :  { %v357_v58 = vpop.permute.xlu0 %356 }
 0x319   :  { %1796 = vrsqrt.f32 %v259_v38  ;;  %v260_v41 = vadd.f32 1e-12, %v256_v40 }
 0x31a   :  { %v353_v51 = vpop.permute.xlu1 %352 }
 0x31b   :  { %1798 = vrsqrt.f32 %v260_v41 }
 0x31c   :  { %v361_v11 = vpop.permute.xlu0 %360 }
 0x31e   :  { %v355_v53 = vpop.permute.xlu1 %354 }
 0x322   :  { %v359_v57 = vpop.permute.xlu1 %358 }
 0x323   :  { %v1797_v43 = vpop.eup %1796 }
 0x324   :  { %v263_v47 = vmul.f32 %v1797_v43, %v257_v44 }
 0x325   :  { %v1799_v46 = vpop.eup %1798 }
 0x326   :  { %v264_v48 = vmul.f32 %v1799_v46, %v258_v45  ;;  %v363_v3 = vpop.permute.xlu1 %362 }
 0x328   :  { %v265_v49 = vpack.c.bf16 %v264_v48, %v263_v47 }
 0x32a   :  { %1554 = vmatmul.mubr.msk.bf16.vlgmr.msra.gmra.mrb[0].mxu0 %vm31_vm0, %v265_v49 }
 0x3fd   :  { %v325_v59 = vpop.f32.mrb[0].mxu0 }
 0x3fe   :  { %v2071_v60 = vadd.f32 %v325_v59, %v275_v56  ;;  %v1555_v61 = vpop.f32.mrb[1].mxu0 }
 0x3ff   :  { %v328_v62 = vpop.f32.mrb[2].mxu0 }
 0x400   :  { %v2073_v63 = vadd.f32 %v328_v62, %v275_v56  ;;  %v1556_v2 = vpop.f32.mrb[3].mxu0  ;;  %1573 = vmatprep.mubr.msk.f32.mxu0 %vm31_vm0, %v2071_v60  ;;  %v372_v4 = vmul.f32 %v349_v55, %v2071_v60  ;;  %v374_v6 = vmul.f32 %v353_v51, %v2071_v60  ;;  %v378_v1 = vmul.f32 %v361_v11, %v2071_v60  ;;  %v413_v55 = vld [vmem:[%s2412_s3 + $0x48] sm:$0xff]  ;;  %v412_v56 = vld [vmem:[%s2412_s3 + $0x40] sm:$0xff]  ;;  %v576_v11 = vld [vmem:[%s2412_s3 + $0x10] sm:$0xff] }
 0x401   :  { %v376_v15 = vmul.f32 %v357_v58, %v2071_v60 }
 0x402   :  { %v373_v5 = vmul.f32 %v351_v50, %v2073_v63  ;;  %v375_v8 = vmul.f32 %v355_v53, %v2073_v63  ;;  %v379_v12 = vmul.f32 %v363_v3, %v2073_v63  ;;  %v377_v0 = vmul.f32 %v359_v57, %v2073_v63 }
 0x404   :  { %v1724_v13 = vpack.i.bf16 %v373_v5, %v372_v4  ;;  %v1729_v14 = vpack.i.bf16 %v375_v8, %v374_v6  ;;  %v1739_v16 = vpack.i.bf16 %v379_v12, %v378_v1  ;;  %v1734_v25 = vpack.i.bf16 %v377_v0, %v376_v15  ;;  %v574_v6 = vld [vmem:[%s2412_s3] sm:$0xff]  ;;  %v577_v12 = vld [vmem:[%s2412_s3 + $0x18] sm:$0xff]  ;;  %v579_v0 = vld [vmem:[%s2412_s3 + $0x28] sm:$0xff] }
 0x405   :  { %v581_v15 = vld [vmem:[%s2412_s3 + $0x38] sm:$0xff] }
 0x406   :  { %1725 = vrot.lane.b32.xlu0 %v1724_v13, %s1871_s6  ;;  %1730 = vrot.lane.b32.xlu1 %v1729_v14, %s1871_s6  ;;  %v1686_v13 = vpack.c.bf16 %v577_v12, %v576_v11  ;;  %v578_v14 = vld [vmem:[%s2412_s3 + $0x20] sm:$0xff] }
 0x407   :  { %v1690_v1 = vpack.c.bf16 %v579_v0, %v578_v14 }
 0x40a   :  { %1735 = vrot.lane.b32.xlu0 %v1734_v25, %s1871_s6  ;;  %1740 = vrot.lane.b32.xlu1 %v1739_v16, %s1871_s6 }
 0x40e   :  { %419 = vrot.lane.b32.xlu0 %v418_v27, %s1872_s21  ;;  %422 = vrot.lane.b32.xlu1 %v418_v27, %s1870_s0 }
 0x412   :  { %425 = vrot.lane.b32.xlu0 %v418_v27, %s1873_s22 }
 0x478   :  { %v1726_v28 = vpop.permute.xlu0 %1725  ;;  %v1731_v29 = vpop.permute.xlu1 %1730 }
 0x479   :  { %v1728_v30 = vunpack.i.h.bf16 %v1726_v28  ;;  %v1727_v31 = vunpack.i.l.bf16 %v1726_v28  ;;  %v1733_v32 = vunpack.i.h.bf16 %v1731_v29  ;;  %v1732_v33 = vunpack.i.l.bf16 %v1731_v29 }
 0x47b   :  { %v1658_v35 = vpack.c.bf16 %v1728_v30, %v1727_v31  ;;  %v1664_v36 = vpack.c.bf16 %v1733_v32, %v1732_v33 }
 0x47c   :  { %v1736_v37 = vpop.permute.xlu0 %1735  ;;  %v1741_v43 = vpop.permute.xlu1 %1740 }
 0x47d   :  { %1660 = vmatprep.subr.msk.bf16.mxu0 %vm2096_vm3, %v1658_v35  ;;  %v1738_v38 = vunpack.i.h.bf16 %v1736_v37  ;;  %v1737_v40 = vunpack.i.l.bf16 %v1736_v37  ;;  %v1743_v44 = vunpack.i.h.bf16 %v1741_v43  ;;  %v1742_v45 = vunpack.i.l.bf16 %v1741_v43 }
 0x47e   :  { %1663 = vmatpush3.bf16.xpose.msk.msra.mxu0 %vm2096_vm3, %v1658_v35 }
 0x47f   :  { %1666 = vmatprep.subr.msk.bf16.mxu0 %vm2096_vm3, %v1664_v36  ;;  %v1670_v41 = vpack.c.bf16 %v1738_v38, %v1737_v40  ;;  %v1676_v46 = vpack.c.bf16 %v1743_v44, %v1742_v45 }
 0x480   :  { %v420_v47 = vpop.permute.xlu0 %419  ;;  %v423_v49 = vpop.permute.xlu1 %422 }
 0x481   :  { %v429_v48 = vsel %vm428_vm4, %v30_v26, %v420_v47 }
 0x482   :  { %v430_v50 = vsel %vm31_vm0, %v429_v48, %v423_v49  ;;  %v1772_v48 = vld [vmem:[%s2413_s4 + $0x40] sm:$0xff]  }
 0x484   :  { %v426_v51 = vpop.permute.xlu0 %425 }
 0x485   :  { %v432_v52 = vsel %vm431_vm5, %v430_v50, %v426_v51 }
 0x486   :  { %1669 = vmatpush3.bf16.xpose.msk.msra.mxu0 %vm2096_vm3, %v1664_v36  ;;  %v1425_v53 = vadd.f32 -1.0, %v432_v52 }
 0x487   :  { %1672 = vmatprep.subr.msk.bf16.mxu0 %vm2096_vm3, %v1670_v41 }
 0x488   :  { %v434_v54 = vmul.f32 1e+09, %v1425_v53 }
 0x48a   :  { %v559_v57 = vrot.slane %v434_v54, %v1978_v42  ;;  %v575_v42 = vld [vmem:[%s2412_s3 + $0x8] sm:$0xff] }
 0x48b   :  { %v1682_v8 = vpack.c.bf16 %v575_v42, %v574_v6 }
 0x48d   :  { %1683 = vmatprep.subr.bf16.mxu1 %v1682_v8 }
 0x48e   :  { %1675 = vmatpush3.bf16.xpose.msk.msra.mxu0 %vm2096_vm3, %v1670_v41  ;;  %1685 = vmatpush3.bf16.msra.mxu1 %v1682_v8 }
 0x48f   :  { %1678 = vmatprep.subr.msk.bf16.mxu0 %vm2096_vm3, %v1676_v46  ;;  %1687 = vmatprep.subr.bf16.mxu1 %v1686_v13 }
 0x492   :  { %1689 = vmatpush3.bf16.msra.mxu1 %v1686_v13  ;;  %v1773_v13 = vld [vmem:[%s2413_s4 + $0x48] sm:$0xff]  }
 0x493   :  { %1691 = vmatprep.subr.bf16.mxu1 %v1690_v1 }
 0x496   :  { %1681 = vmatpush3.bf16.xpose.msk.msra.mxu0 %vm2096_vm3, %v1676_v46  ;;  %1693 = vmatpush3.bf16.msra.mxu1 %v1690_v1 }
 0x497   :  { %1614 = vmatprep.subr.bf16.mxu0 %v1868_v9 }
 0x49d   :  { %1574 = vmatmul.mubr.msk.f32.vlgmr.msra.gmra.mrb[4].mxu0 %vm31_vm0, %v2073_v63 }
 0x49e   :  { %1618 = vmatprep.mubr.msk.bf16.mxu0 %vm1869_vm1, %v1868_v9  ;;  %1615 = vmatpush3.bf16.msra.mxu0 %v1772_v48 }
 0x49f   :  { %1616 = vmatprep.subr.bf16.mxu0 %v1868_v9 }
 0x4a2   :  { %1617 = vmatpush3.bf16.msra.mxu0 %v1773_v13  ;;  %v1776_v13 = vld [vmem:[%s2413_s4 + $0x50] sm:$0xff]  }
 0x4a3   :  { %1630 = vmatprep.subr.bf16.mxu0 %v1868_v9 }
 0x570   :  { %v1575_v58 = vpop.f32.mrb[4].mxu0 }
 0x571   :  { %v553_v59 = vadd.f32 %v1575_v58, %v413_v55  ;;  %v547_v61 = vpop.f32.mrb[5].mxu0 }
 0x572   :  { %v548_v62 = vadd.f32 %v547_v61, %v412_v56 }
 0x573   :  { %v561_v2 = vadd.f32 %v559_v57, %v553_v59 }
 0x574   :  { %v560_v3 = vadd.f32 %v559_v57, %v548_v62 }
 0x575   :  { %v565_v4 = vsel %vm184_vm2, %v561_v2, -inf }
 0x576   :  { %566 = vmax.xlane.f32.xlu0 %v565_v4  ;;  %v562_v5 = vsel %vm184_vm2, %v560_v3, -inf }
 0x577   :  { %563 = vmax.xlane.f32.xlu1 %v562_v5 }
 0x588   :  { %382 = vrot.lane.b32.xlu1 %v2011_v17, %s1874_s10  ;;  %v580_v17 = vld [vmem:[%s2412_s3 + $0x30] sm:$0xff] }
 0x58c   :  { %380 = vrot.lane.b32.xlu0 %v2016_v18, %s1874_s10  ;;  %384 = vrot.lane.b32.xlu1 %v2025_v19, %s1874_s10  ;;  %v1694_v18 = vpack.c.bf16 %v581_v15, %v580_v17  ;;  %v1440_v17 = vld [vmem:[%s2411_s2 + $0x2] ss:$0 sm:$0xff] }
 0x58e   :  { %1695 = vmatprep.subr.bf16.mxu1 %v1694_v18 }
 0x58f   :  { %1697 = vmatpush3.bf16.msra.mxu1 %v1694_v18 }
 0x590   :  { %386 = vrot.lane.b32.xlu0 %v2039_v21, %s1874_s10  ;;  %388 = vrot.lane.b32.xlu1 %v2030_v20, %s1874_s10 }
 0x594   :  { %390 = vrot.lane.b32.xlu0 %v2053_v23, %s1874_s10  ;;  %392 = vrot.lane.b32.xlu1 %v2044_v22, %s1874_s10 }
 0x598   :  { %394 = vrot.lane.b32.xlu0 %v2060_v24, %s1874_s10 }
 0x603   :  { %v567_v19 = vpop.xlane.xlu0 %566 }
 0x604   :  { %v569_v16 = vsub.f32 %v561_v2, %v567_v19  ;;  %v564_v25 = vpop.xlane.xlu1 %563 }
 0x605   :  { %v568_v26 = vsub.f32 %v560_v3, %v564_v25 }
 0x606   :  { %v572_v21 = vmul.f32 1.442695, %v569_v16 }
 0x607   :  { %v570_v27 = vmul.f32 1.442695, %v568_v26  ;;  %v381_v28 = vpop.permute.xlu0 %380 }
 0x608   :  { %v404_v20 = vmul.f32 %v381_v28, %v2071_v60  ;;  %v383_v29 = vpop.permute.xlu1 %382 }
 0x609   :  { %1800 = vpow2.f32 %v570_v27  ;;  %v405_v30 = vmul.f32 %v383_v29, %v2073_v63 }
 0x60a   :  { %1802 = vpow2.f32 %v572_v21 }
 0x60b   :  { %v1744_v23 = vpack.i.bf16 %v405_v30, %v404_v20  ;;  %v387_v31 = vpop.permute.xlu0 %386 }
 0x60c   :  { %v407_v22 = vmul.f32 %v387_v31, %v2073_v63  ;;  %v385_v32 = vpop.permute.xlu1 %384  ;;  %v1775_v31 = vld [vmem:[%s2414_s5 + $0x28] sm:$0xff]  }
 0x60d   :  { %v406_v24 = vmul.f32 %v385_v32, %v2071_v60  ;;  %1745 = vrot.lane.b32.xlu1 %v1744_v23, %s1874_s10  ;;  %v1774_v23 = vld [vmem:[%s2414_s5 + $0x20] sm:$0xff]  }
 0x60f   :  { %v1749_v33 = vpack.i.bf16 %v407_v22, %v406_v24  ;;  %v391_v34 = vpop.permute.xlu0 %390 }
 0x610   :  { %v409_v35 = vmul.f32 %v391_v34, %v2073_v63  ;;  %v389_v36 = vpop.permute.xlu1 %388 }
 0x611   :  { %v408_v37 = vmul.f32 %v389_v36, %v2071_v60  ;;  %1750 = vrot.lane.b32.xlu0 %v1749_v33, %s1874_s10 }
 0x613   :  { %v1801_v38 = vpop.eup %1800  ;;  %v1754_v40 = vpack.i.bf16 %v409_v35, %v408_v37  ;;  %v395_v41 = vpop.permute.xlu0 %394 }
 0x614   :  { %v1803_v43 = vpop.eup %1802  ;;  %v411_v44 = vmul.f32 %v395_v41, %v2073_v63  ;;  %1592 = vmatprep.mubr.msk.f32.mxu1 %vm184_vm2, %v1801_v38  ;;  %v393_v45 = vpop.permute.xlu1 %392 }
 0x615   :  { %v410_v46 = vmul.f32 %v393_v45, %v2071_v60  ;;  %1593 = vmatmul.mubr.msk.f32.vlgmr.msra.gmra.mrb[8].mxu1 %vm184_vm2, %v1803_v43  ;;  %1755 = vrot.lane.b32.xlu1 %v1754_v40, %s1874_s10 }
 0x617   :  { %v1759_v47 = vpack.i.bf16 %v411_v44, %v410_v46 }
 0x619   :  { %1760 = vrot.lane.b32.xlu0 %v1759_v47, %s1874_s10  ;;  %s1400_s10 = sshll.u32 %s1875_s9, 4  ;;  %s1401_s10 = int_to_ptr.vmem [resolvable:$true] %s1400_s10 }
 0x61a   :  { %p1849_p1 = scmp.lt.s32.totalorder %s1401_s10, %s1401_s10 }
 0x67f   :  { %v1746_v63 = vpop.permute.xlu1 %1745 }
 0x680   :  { %v1748_v49 = vunpack.i.h.bf16 %v1746_v63  ;;  %v1747_v50 = vunpack.i.l.bf16 %v1746_v63 }
 0x682   :  { %v1698_v51 = vpack.c.bf16 %v1748_v49, %v1747_v50 }
 0x683   :  { %v1751_v52 = vpop.permute.xlu0 %1750 }
 0x684   :  { %v1753_v60 = vunpack.i.h.bf16 %v1751_v52  ;;  %v1752_v53 = vunpack.i.l.bf16 %v1751_v52  ;;  %1699 = vmatprep.subr.bf16.mxu1 %v1698_v51 }
 0x685   :  { %1701 = vmatpush3.bf16.msra.mxu1 %v1698_v51 }
 0x686   :  { %v1702_v54 = vpack.c.bf16 %v1753_v60, %v1752_v53  ;;  %v887_v53 = vld [vmem:[%s2414_s5 + $0x30] sm:$0x2] }
 0x687   :  { %v1756_v55 = vpop.permute.xlu1 %1755 }
 0x688   :  { %v1758_v56 = vunpack.i.h.bf16 %v1756_v55  ;;  %v1757_v57 = vunpack.i.l.bf16 %v1756_v55  ;;  %1703 = vmatprep.subr.bf16.mxu1 %v1702_v54  ;;  %v891_v55 = vsub.s32 2, %v1972_v39 }
 0x689   :  { %1705 = vmatpush3.bf16.msra.mxu1 %v1702_v54  ;;  %v888_v54 = vunpack.c.l.bf16 %v887_v53  ;;  %v1018_v53 = vld [vmem:[%s2411_s2 + $0x51] sm:$0xff] }
 0x68a   :  { %v1706_v58 = vpack.c.bf16 %v1758_v56, %v1757_v57 }
 0x68b   :  { %v1761_v59 = vpop.permute.xlu0 %1760  ;;  %v892_v56 = vrot.slane %v888_v54, %v891_v55 }
 0x68c   :  { %v1763_v61 = vunpack.i.h.bf16 %v1761_v59  ;;  %v1762_v62 = vunpack.i.l.bf16 %v1761_v59  ;;  %1707 = vmatprep.subr.bf16.mxu1 %v1706_v58 }
 0x68d   :  { %1709 = vmatpush3.bf16.msra.mxu1 %v1706_v58 }
 0x68e   :  { %v1710_v2 = vpack.c.bf16 %v1763_v61, %v1762_v62 }
 0x690   :  { %1711 = vmatprep.subr.bf16.mxu1 %v1710_v2 }
 0x691   :  { %1713 = vmatpush3.bf16.msra.mxu1 %v1710_v2 }
 0x692   :  { %1622 = vmatprep.subr.bf16.mxu1 %v1868_v9 }
 0x6e8   :  { %v1594_v3 = vpop.f32.mrb[8].mxu1 }
 0x6e9   :  { %v664_v4 = vmax.f32 %v1594_v3, 1e-30  ;;  %v654_v5 = vpop.f32.mrb[9].mxu1 }
 0x6ea   :  { %v663_v6 = vmax.f32 %v654_v5, 1e-30 }
 0x6eb   :  { %1804 = vrcp.f32 %v664_v4 }
 0x6ec   :  { %1806 = vrcp.f32 %v663_v6 }
 0x6f5   :  { %v1805_v42 = vpop.eup %1804 }
 0x6f6   :  { %v1807_v8 = vpop.eup %1806  ;;  %v668_v12 = vmul.f32 %v1805_v42, %v1803_v43 }
 0x6f7   :  { %v667_v11 = vmul.f32 %v1807_v8, %v1801_v38 }
 0x6f9   :  { %1611 = vmatprep.mubr.msk.f32.mxu1 %vm184_vm2, %v667_v11 }
 0x6fa   :  { %1612 = vmatmul.mubr.msk.f32.vlgmr.msra.gmra.mrb[10].mxu1 %vm184_vm2, %v668_v12 }
 0x6fb   :  { %1626 = vmatprep.mubr.msk.bf16.mxu1 %vm1869_vm1, %v1868_v9  ;;  %1623 = vmatpush3.bf16.msra.mxu1 %v1774_v23  ;;  %v1000_v23 = vld [vmem:[%s2411_s2 + $0x29] sm:$0xff] }
 0x6fc   :  { %1624 = vmatprep.subr.bf16.mxu1 %v1868_v9 }
 0x6ff   :  { %1625 = vmatpush3.bf16.msra.mxu1 %v1775_v31  ;;  %v1001_v31 = vld [vmem:[%s2411_s2 + $0x31] sm:$0xff] }
 0x700   :  { %1638 = vmatprep.subr.bf16.mxu1 %v1868_v9 }
 0x7cd   :  { %v1613_v14 = vpop.f32.mrb[10].mxu1 }
 0x7ce   :  { %v773_v0 = vpop.f32.mrb[11].mxu1 }
 0x7cf   :  { %v782_v1 = vpack.c.bf16 %v1613_v14, %v773_v0  ;;  %v1777_v14 = vld [vmem:[%s2413_s4 + $0x58] sm:$0xff]  }
 0x7d1   :  { %1619 = vmatmul.mubr.msk.bf16.vlgmr.msra.gmra.mrb[8].mxu0 %vm31_vm0, %v782_v1 }
 0x7d2   :  { %1634 = vmatprep.mubr.msk.bf16.mxu0 %vm1869_vm1, %v1868_v9  ;;  %1631 = vmatpush3.bf16.msra.mxu0 %v1776_v13 }
 0x7d3   :  { %1632 = vmatprep.subr.bf16.mxu0 %v1868_v9 }
 0x7d6   :  { %1633 = vmatpush3.bf16.msra.mxu0 %v1777_v14 }
 0x7d7   :  { %1646 = vmatprep.subr.bf16.mxu0 %v1868_v9 }
 0x8a4   :  { %v841_v15 = vpop.f32.mrb[8].mxu0 }
 0x8a5   :  { %v842_v18 = vadd.f32 %v1440_v17, %v841_v15  ;;  %v1620_v19 = vpop.f32.mrb[9].mxu0 }
 0x8a6   :  { %v844_v16 = vpop.f32.mrb[10].mxu0  ;;  %v978_v19 = vld [vmem:[%s2411_s2 + $0x9] sm:$0xff] }
 0x8a7   :  { %v2205_v25 = vadd.f32 %v842_v18, %v1986_v7  ;;  %v845_v26 = vadd.f32 %v1440_v17, %v844_v16  ;;  %v1621_v21 = vpop.f32.mrb[11].mxu0  ;;  %v979_v16 = vld [vmem:[%s2411_s2 + $0x11] sm:$0xff] }
 0x8a8   :  { %v989_v21 = vld [vmem:[%s2411_s2 + $0x19] sm:$0xff] }
 0x8a9   :  { %v2208_v27 = vadd.f32 %v845_v26, %v1989_v10  ;;  %v850_v28 = vsel %vm31_vm0, %v2205_v25, 0.0  ;;  %v858_v29 = vmul.f32 %v2205_v25, %v2205_v25 }
 0x8aa   :  { %851 = vadd.xlane.f32.xlu1 %v850_v28  ;;  %v990_v28 = vld [vmem:[%s2411_s2 + $0x21] sm:$0xff] }
 0x8ab   :  { %v853_v20 = vsel %vm31_vm0, %v2208_v27, 0.0  ;;  %v860_v30 = vsel %vm31_vm0, %v858_v29, 0.0  ;;  %v859_v7 = vmul.f32 %v2208_v27, %v2208_v27 }
 0x8ac   :  { %854 = vadd.xlane.f32.xlu0 %v853_v20 }
 0x8ad   :  { %v863_v10 = vsel %vm31_vm0, %v859_v7, 0.0 }
 0x8b0   :  { %861 = vadd.xlane.f32.xlu0 %v860_v30 }
 0x8b4   :  { %864 = vadd.xlane.f32.xlu0 %v863_v10 }
 0x937   :  { %v852_v22 = vpop.xlane.xlu1 %851 }
 0x938   :  { %v856_v24 = vmul.f32 0.03125, %v852_v22 }
 0x939   :  { %v855_v32 = vpop.xlane.xlu0 %854 }
 0x93a   :  { %v868_v34 = vmul.f32 %v856_v24, %v856_v24  ;;  %v857_v35 = vmul.f32 0.03125, %v855_v32  ;;  %v874_v63 = vsub.f32 %v2205_v25, %v856_v24 }
 0x93c   :  { %v869_v40 = vmul.f32 %v857_v35, %v857_v35  ;;  %v875_v49 = vsub.f32 %v2208_v27, %v857_v35 }
 0x93d   :  { %v862_v33 = vpop.xlane.xlu0 %861 }
 0x93e   :  { %v866_v36 = vmul.f32 0.03125, %v862_v33 }
 0x940   :  { %v870_v37 = vsub.f32 %v866_v36, %v868_v34 }
 0x941   :  { %v865_v38 = vpop.xlane.xlu0 %864 }
 0x942   :  { %v872_v41 = vmax.f32 %v870_v37, 0.0  ;;  %v867_v43 = vmul.f32 0.03125, %v865_v38  ;;  %v1006_v38 = vld [vmem:[%s2411_s2 + $0x39] sm:$0xff] }
 0x944   :  { %v876_v44 = vadd.f32 1e-12, %v872_v41  ;;  %v871_v45 = vsub.f32 %v867_v43, %v869_v40  ;;  %v1007_v41 = vld [vmem:[%s2411_s2 + $0x41] sm:$0xff] }
 0x946   :  { %v873_v46 = vmax.f32 %v871_v45, 0.0  ;;  %1808 = vrsqrt.f32 %v876_v44 }
 0x948   :  { %v877_v47 = vadd.f32 1e-12, %v873_v46 }
 0x94a   :  { %1810 = vrsqrt.f32 %v877_v47 }
 0x950   :  { %v1809_v48 = vpop.eup %1808 }
 0x951   :  { %v880_v51 = vmul.f32 %v1809_v48, %v874_v63 }
 0x954   :  { %v1811_v50 = vpop.eup %1810 }
 0x955   :  { %v881_v52 = vmul.f32 %v1811_v50, %v875_v49 }
 0x957   :  { %v882_v60 = vpack.c.bf16 %v881_v52, %v880_v51 }
 0x959   :  { %1627 = vmatmul.mubr.msk.bf16.vlgmr.msra.gmra.mrb[12].mxu1 %vm31_vm0, %v882_v60  ;;  %v1017_v60 = vld [vmem:[%s2411_s2 + $0x49] sm:$0xff] }
 0x95a   :  { %1642 = vmatprep.mubr.msk.bf16.mxu1 %vm1869_vm1, %v1868_v9 }
 0xa2c   :  { %v942_v57 = vpop.f32.mrb[12].mxu1 }
 0xa2d   :  { %v943_v58 = vadd.f32 %v942_v57, %v892_v56  ;;  %v1628_v59 = vpop.f32.mrb[13].mxu1 }
 0xa2e   :  { %v945_v61 = vpop.f32.mrb[14].mxu1 }
 0xa2f   :  { %v1447_v62 = vmul.f32 -1.442695, %v943_v58  ;;  %v946_v2 = vadd.f32 %v945_v61, %v892_v56  ;;  %v1629_v3 = vpop.f32.mrb[15].mxu1 }
 0xa31   :  { %1812 = vpow2.f32 %v1447_v62  ;;  %v1448_v4 = vmul.f32 -1.442695, %v946_v2  ;;  %v1028_v62 = vld [vmem:[%s2411_s2 + $0x59] sm:$0xff] }
 0xa33   :  { %1814 = vpow2.f32 %v1448_v4 }
 0xa3b   :  { %v1813_v5 = vpop.eup %1812 }
 0xa3c   :  { %v955_v6 = vadd.f32 1.0, %v1813_v5 }
 0xa3d   :  { %v1815_v42 = vpop.eup %1814 }
 0xa3e   :  { %1816 = vrcp.f32 %v955_v6  ;;  %v956_v8 = vadd.f32 1.0, %v1815_v42 }
 0xa40   :  { %1818 = vrcp.f32 %v956_v8 }
 0xa48   :  { %v1817_v11 = vpop.eup %1816 }
 0xa49   :  { %963 = vrot.lane.b32.xlu1 %v1817_v11, %s1871_s6  ;;  %v1039_v11 = vld [vmem:[%s2411_s2 + $0x69] sm:$0xff] }
 0xa4a   :  { %v1819_v12 = vpop.eup %1818 }
 0xa4b   :  { %965 = vrot.lane.b32.xlu0 %v1819_v12, %s1871_s6  ;;  %v1040_v12 = vld [vmem:[%s2411_s2 + $0x71] sm:$0xff]  ;;  %s1844_s6 = scalar_lea.vmem %s1401_s10, 256 }
 0xa4c   :  { %p1845_p0 = scmp.ne.s32.totalorder %s1401_s10, %s1844_s6  ;;  %p1850_p2 = scmp.lt.s32.totalorder %s1844_s6, %s1844_s6 }
 0xa4e   :  { %p1851_p3 = por %p1850_p2, %p1849_p1 }
 0xa50   :  { %p1852_p4 = pnand %p1851_p3, %p1845_p0 }
 0xabb   :  { %v964_v0 = vpop.permute.xlu1 %963 }
 0xabc   :  { %v969_v1 = vmul.f32 %v964_v0, %v943_v58 }
 0xabd   :  { %v966_v17 = vpop.permute.xlu0 %965 }
 0xabe   :  { %v970_v15 = vmul.f32 %v966_v17, %v946_v2  ;;  %v971_v18 = vrot.slane %v969_v1, 5  ;;  %v984_v26 = vrot.slane %v969_v1, 6  ;;  %v995_v7 = vrot.slane %v969_v1, 7  ;;  %v1029_v2 = vld [vmem:[%s2411_s2 + $0x61] sm:$0xff] }
 0xabf   :  { %v1012_v40 = vrot.slane %v969_v1, 1  ;;  %v1023_v49 = vrot.slane %v969_v1, 2  ;;  %v1008_v54 = vmul.f32 %v1006_v38, %v969_v1  ;;  %v1034_v58 = vrot.slane %v969_v1, 3 }
 0xac0   :  { %v972_v20 = vrot.slane %v970_v15, 5  ;;  %v985_v29 = vrot.slane %v970_v15, 6  ;;  %v996_v30 = vrot.slane %v970_v15, 7  ;;  %v1013_v10 = vrot.slane %v970_v15, 1 }
 0xac1   :  { %v1024_v45 = vrot.slane %v970_v15, 2  ;;  %v1035_v50 = vrot.slane %v970_v15, 3  ;;  %v1009_v56 = vmul.f32 %v1007_v41, %v970_v15 }
 0xac2   :  { %v976_v22 = vsel %vm975_vm6, %v971_v18, %v972_v20  ;;  %v977_v32 = vsel %vm975_vm6, %v972_v20, %v971_v18  ;;  %v987_v24 = vsel %vm986_vm7, %v984_v26, %v985_v29  ;;  %v988_v33 = vsel %vm986_vm7, %v985_v29, %v984_v26 }
 0xac3   :  { %v980_v34 = vmul.f32 %v978_v19, %v977_v32  ;;  %v981_v35 = vmul.f32 %v979_v16, %v976_v22  ;;  %v991_v36 = vmul.f32 %v989_v21, %v988_v33  ;;  %v992_v37 = vmul.f32 %v990_v28, %v987_v24  ;;  %v1449_v16 = vld [vmem:[%s2411_s2 + $0x3] ss:$0 sm:$0xff]  ;;  %v1450_v28 = vld [vmem:[%s2411_s2 + $0x4] ss:$0 sm:$0xff] }
 0xac4   :  { %v998_v43 = vsel %vm997_vm8, %v995_v7, %v996_v30  ;;  %v999_v44 = vsel %vm997_vm8, %v996_v30, %v995_v7  ;;  %v1015_v51 = vsel %vm1014_vm9, %v1012_v40, %v1013_v10  ;;  %v1016_v52 = vsel %vm1014_vm9, %v1013_v10, %v1012_v40  ;;  %v1451_v30 = vld [vmem:[%s2411_s2 + $0x5] ss:$0 sm:$0xff] }
 0xac5   :  { %v994_v46 = vadd.f32 %v992_v37, %v981_v35  ;;  %v1002_v47 = vmul.f32 %v1000_v23, %v999_v44  ;;  %v1003_v48 = vmul.f32 %v1001_v31, %v998_v43  ;;  %v993_v63 = vadd.f32 %v991_v36, %v980_v34  ;;  %v1454_v43 = vld [vmem:[%s2411_s2 + $0x6] ss:$0 sm:$0xff] }
 0xac6   :  { %v1026_v59 = vsel %vm1025_vm10, %v1023_v49, %v1024_v45  ;;  %v1027_v61 = vsel %vm1025_vm10, %v1024_v45, %v1023_v49  ;;  %v1019_v5 = vmul.f32 %v1017_v60, %v1015_v51  ;;  %v1020_v6 = vmul.f32 %v1018_v53, %v1016_v52 }
 0xac7   :  { %v1005_v55 = vadd.f32 %v1003_v48, %v994_v46  ;;  %v1004_v57 = vadd.f32 %v1002_v47, %v993_v63  ;;  %v1037_v42 = vsel %vm1036_vm11, %v1034_v58, %v1035_v50  ;;  %v1038_v8 = vsel %vm1036_vm11, %v1035_v50, %v1034_v58 }
 0xac8   :  { %v1030_v0 = vmul.f32 %v1028_v62, %v1026_v59  ;;  %v1031_v1 = vmul.f32 %v1029_v2, %v1027_v61  ;;  %v1041_v18 = vmul.f32 %v1039_v11, %v1037_v42  ;;  %v1042_v19 = vmul.f32 %v1040_v12, %v1038_v8 }
 0xac9   :  { %v1011_v3 = vadd.f32 %v1009_v56, %v1005_v55  ;;  %v1010_v4 = vadd.f32 %v1008_v54, %v1004_v57  ;;  %v1778_v54 = vld [vmem:[%s2414_s5 + $0x10] sm:$0xff]   ;;  %v1779_v55 = vld [vmem:[%s2414_s5 + $0x18] sm:$0xff]  }
 0xaca   :  { %1639 = vmatpush3.bf16.msra.mxu1 %v1778_v54 }
 0xacb   :  { %v1021_v13 = vadd.f32 %v1019_v5, %v1010_v4  ;;  %v1022_v14 = vadd.f32 %v1020_v6, %v1011_v3  ;;  %1640 = vmatprep.subr.bf16.mxu1 %v1868_v9 }
 0xacd   :  { %v1032_v17 = vadd.f32 %v1030_v0, %v1021_v13  ;;  %v1033_v15 = vadd.f32 %v1031_v1, %v1022_v14 }
 0xace   :  { %1641 = vmatpush3.bf16.msra.mxu1 %v1779_v55 }
 0xacf   :  { %v1043_v26 = vadd.f32 %v1041_v18, %v1032_v17  ;;  %v1044_v21 = vadd.f32 %v1042_v19, %v1033_v15 }
 0xad1   :  { %v1050_v20 = vadd.f32 %v1449_v16, %v1043_v26  ;;  %v1051_v29 = vadd.f32 %v1449_v16, %v1044_v21  ;;  %v1780_v16 = vld [vmem:[%s2413_s4 + $0x20] sm:$0xff]   ;;  %v1781_v26 = vld [vmem:[%s2413_s4 + $0x28] sm:$0xff]   ;;  %v1782_v21 = vld [vmem:[%s2413_s4 + $0x30] sm:$0xff]  }
 0xad3   :  { %v1057_v7 = vmul.f32 %v1450_v28, %v1050_v20  ;;  %v1058_v10 = vmul.f32 %v1450_v28, %v1051_v29  ;;  %v1783_v28 = vld [vmem:[%s2413_s4 + $0x38] sm:$0xff]   ;;  %v1185_v20 = vld [vmem:[%s2414_s5 + $0x30] sm:$0x1] }
 0xad4   :  { %v1186_v29 = vunpack.c.l.bf16 %v1185_v20 }
 0xad5   :  { %v1064_v23 = vadd.f32 %v1451_v30, %v1057_v7  ;;  %v1065_v31 = vadd.f32 %v1451_v30, %v1058_v10  ;;  %v1189_v30 = vsub.s32 1, %v1972_v39 }
 0xad7   :  { %v1452_v22 = vmul.f32 -1.442695, %v1064_v23  ;;  %v1453_v32 = vmul.f32 -1.442695, %v1065_v31  ;;  %v1190_v7 = vrot.slane %v1186_v29, %v1189_v30 }
 0xad9   :  { %1820 = vpow2.f32 %v1452_v22 }
 0xada   :  { %1822 = vpow2.f32 %v1453_v32 }
 0xae3   :  { %v1821_v24 = vpop.eup %1820 }
 0xae4   :  { %v1823_v33 = vpop.eup %1822  ;;  %v1072_v34 = vadd.f32 1.0, %v1821_v24 }
 0xae5   :  { %v1073_v35 = vadd.f32 1.0, %v1823_v33 }
 0xae6   :  { %1824 = vrcp.f32 %v1072_v34 }
 0xae7   :  { %1826 = vrcp.f32 %v1073_v35 }
 0xaf0   :  { %v1825_v36 = vpop.eup %1824 }
 0xaf1   :  { %v1827_v37 = vpop.eup %1826  ;;  %v1078_v38 = vmul.f32 %v1825_v36, %v1064_v23 }
 0xaf2   :  { %v1079_v40 = vmul.f32 %v1827_v37, %v1065_v31 }
 0xaf4   :  { %v1080_v41 = vpack.c.bf16 %v1079_v40, %v1078_v38 }
 0xaf6   :  { %1635 = vmatmul.mubr.msk.bf16.vlgmr.msra.gmra.mrb[12].mxu0 %vm31_vm0, %v1080_v41 }
 0xaf7   :  { %1654 = vmatprep.mubr.msk.bf16.mxu0 %vm1869_vm1, %v1868_v9  ;;  %1647 = vmatpush3.bf16.msra.mxu0 %v1780_v16  ;;  %v1470_v16 = vld [vmem:[%s2411_s2 + $0x1] ss:$0 sm:$0xff] }
 0xaf8   :  { %1648 = vmatprep.subr.bf16.mxu0 %v1868_v9 }
 0xafb   :  { %1649 = vmatpush3.bf16.msra.mxu0 %v1781_v26 }
 0xafc   :  { %1650 = vmatprep.subr.bf16.mxu0 %v1868_v9 }
 0xaff   :  { %1651 = vmatpush3.bf16.msra.mxu0 %v1782_v21 }
 0xb00   :  { %1652 = vmatprep.subr.bf16.mxu0 %v1868_v9 }
 0xb03   :  { %1653 = vmatpush3.bf16.msra.mxu0 %v1783_v28 }
 0xbc9   :  { %v1139_v44 = vpop.f32.mrb[12].mxu0 }
 0xbca   :  { %v1140_v45 = vadd.f32 %v1454_v43, %v1139_v44  ;;  %v1636_v46 = vpop.f32.mrb[13].mxu0  ;;  %v1463_v44 = vld [vmem:[%s2411_s2 + $0x8] ss:$0 sm:$0xff] }
 0xbcb   :  { %v1142_v47 = vpop.f32.mrb[14].mxu0 }
 0xbcc   :  { %v2335_v48 = vadd.f32 %v1140_v45, %v2205_v25  ;;  %v1143_v63 = vadd.f32 %v1454_v43, %v1142_v47  ;;  %v1637_v49 = vpop.f32.mrb[15].mxu0 }
 0xbce   :  { %v2338_v50 = vadd.f32 %v1143_v63, %v2208_v27  ;;  %v1148_v51 = vsel %vm31_vm0, %v2335_v48, 0.0  ;;  %v1156_v52 = vmul.f32 %v2335_v48, %v2335_v48 }
 0xbcf   :  { %1149 = vadd.xlane.f32.xlu1 %v1148_v51 }
 0xbd0   :  { %v1151_v60 = vsel %vm31_vm0, %v2338_v50, 0.0  ;;  %v1157_v53 = vmul.f32 %v2338_v50, %v2338_v50  ;;  %v1158_v25 = vsel %vm31_vm0, %v1156_v52, 0.0 }
 0xbd1   :  { %1152 = vadd.xlane.f32.xlu0 %v1151_v60 }
 0xbd2   :  { %v1161_v27 = vsel %vm31_vm0, %v1157_v53, 0.0 }
 0xbd3   :  { %1159 = vadd.xlane.f32.xlu1 %v1158_v25 }
 0xbd5   :  { %1162 = vadd.xlane.f32.xlu0 %v1161_v27 }
 0xc5c   :  { %v1150_v56 = vpop.xlane.xlu1 %1149 }
 0xc5d   :  { %v1154_v57 = vmul.f32 0.03125, %v1150_v56 }
 0xc5e   :  { %v1153_v58 = vpop.xlane.xlu0 %1152 }
 0xc5f   :  { %v1155_v59 = vmul.f32 0.03125, %v1153_v58  ;;  %v1166_v62 = vmul.f32 %v1154_v57, %v1154_v57  ;;  %v1172_v0 = vsub.f32 %v2335_v48, %v1154_v57 }
 0xc60   :  { %v1160_v61 = vpop.xlane.xlu1 %1159 }
 0xc61   :  { %v1164_v2 = vmul.f32 0.03125, %v1160_v61  ;;  %v1167_v4 = vmul.f32 %v1155_v59, %v1155_v59  ;;  %v1173_v1 = vsub.f32 %v2338_v50, %v1155_v59 }
 0xc62   :  { %v1163_v3 = vpop.xlane.xlu0 %1162 }
 0xc63   :  { %v1168_v5 = vsub.f32 %v1164_v2, %v1166_v62  ;;  %v1165_v6 = vmul.f32 0.03125, %v1163_v3 }
 0xc65   :  { %v1170_v42 = vmax.f32 %v1168_v5, 0.0  ;;  %v1169_v8 = vsub.f32 %v1165_v6, %v1167_v4 }
 0xc67   :  { %v1174_v11 = vadd.f32 1e-12, %v1170_v42  ;;  %v1171_v12 = vmax.f32 %v1169_v8, 0.0 }
 0xc69   :  { %1828 = vrsqrt.f32 %v1174_v11  ;;  %v1175_v13 = vadd.f32 1e-12, %v1171_v12 }
 0xc6b   :  { %1830 = vrsqrt.f32 %v1175_v13 }
 0xc73   :  { %v1829_v14 = vpop.eup %1828 }
 0xc74   :  { %v1178_v15 = vmul.f32 %v1829_v14, %v1172_v0 }
 0xc75   :  { %v1831_v17 = vpop.eup %1830 }
 0xc76   :  { %v1179_v18 = vmul.f32 %v1831_v17, %v1173_v1  ;;  %v1469_v17 = vld [vmem:[%s2411_s2] ss:$0 sm:$0xff] }
 0xc78   :  { %v1180_v19 = vpack.c.bf16 %v1179_v18, %v1178_v15 }
 0xc7a   :  { %1643 = vmatmul.mubr.msk.bf16.vlgmr.msra.gmra.mrb[16].mxu1 %vm31_vm0, %v1180_v19 }
 0xd4d   :  { %v1240_v10 = vpop.f32.mrb[16].mxu1 }
 0xd4e   :  { %v1241_v23 = vadd.f32 %v1240_v10, %v1190_v7  ;;  %v1644_v31 = vpop.f32.mrb[17].mxu1 }
 0xd4f   :  { %v1243_v22 = vpop.f32.mrb[18].mxu1 }
 0xd50   :  { %v1461_v32 = vmul.f32 -1.442695, %v1241_v23  ;;  %v1244_v24 = vadd.f32 %v1243_v22, %v1190_v7  ;;  %v1645_v33 = vpop.f32.mrb[19].mxu1 }
 0xd52   :  { %1832 = vpow2.f32 %v1461_v32  ;;  %v1462_v34 = vmul.f32 -1.442695, %v1244_v24 }
 0xd54   :  { %1834 = vpow2.f32 %v1462_v34 }
 0xd5c   :  { %v1833_v9 = vpop.eup %1832 }
 0xd5d   :  { %v1253_v35 = vadd.f32 1.0, %v1833_v9 }
 0xd5e   :  { %v1835_v36 = vpop.eup %1834 }
 0xd5f   :  { %1836 = vrcp.f32 %v1253_v35  ;;  %v1254_v37 = vadd.f32 1.0, %v1835_v36 }
 0xd61   :  { %1838 = vrcp.f32 %v1254_v37 }
 0xd69   :  { %v1837_v38 = vpop.eup %1836 }
 0xd6a   :  { %v1259_v39 = vmul.f32 %v1837_v38, %v1241_v23 }
 0xd6b   :  { %v1839_v40 = vpop.eup %1838 }
 0xd6c   :  { %v1260_v41 = vmul.f32 %v1839_v40, %v1244_v24 }
 0xd6e   :  { %v1261_v43 = vpack.c.bf16 %v1260_v41, %v1259_v39 }
 0xd70   :  { %1655 = vmatmul.mubr.msk.bf16.vlgmr.msra.gmra.mrb[16].mxu0 %vm184_vm2, %v1261_v43 }
 0xe43   :  { %v1336_v45 = vpop.f32.mrb[16].mxu0 }
 0xe44   :  { %v1337_v46 = vadd.f32 %v1463_v44, %v1336_v45  ;;  %v1656_v47 = vpop.f32.mrb[17].mxu0 }
 0xe45   :  { %v1339_v63 = vpop.f32.mrb[18].mxu0 }
 0xe46   :  { %v1343_v49 = vmul.f32 0.5, %v1337_v46  ;;  %v1340_v51 = vadd.f32 %v1463_v44, %v1339_v63  ;;  %v1657_v52 = vpop.f32.mrb[19].mxu0 }
 0xe48   :  { %v1345_v60 = vadd.f32 %v1343_v49, %v2335_v48  ;;  %v1344_v53 = vmul.f32 0.5, %v1340_v51 }
 0xe4a   :  { %v1346_v25 = vadd.f32 %v1344_v53, %v2338_v50  ;;  %v1347_v27 = vsel %vm31_vm0, %v1345_v60, 0.0  ;;  %v1355_v54 = vmul.f32 %v1345_v60, %v1345_v60 }
 0xe4b   :  { %1348 = vadd.xlane.f32.xlu1 %v1347_v27 }
 0xe4c   :  { %v1350_v55 = vsel %vm31_vm0, %v1346_v25, 0.0  ;;  %v1356_v56 = vmul.f32 %v1346_v25, %v1346_v25  ;;  %v1357_v57 = vsel %vm31_vm0, %v1355_v54, 0.0 }
 0xe4d   :  { %1351 = vadd.xlane.f32.xlu0 %v1350_v55 }
 0xe4e   :  { %v1360_v58 = vsel %vm31_vm0, %v1356_v56, 0.0 }
 0xe4f   :  { %1358 = vadd.xlane.f32.xlu1 %v1357_v57 }
 0xe51   :  { %1361 = vadd.xlane.f32.xlu0 %v1360_v58 }
 0xed8   :  { %v1349_v59 = vpop.xlane.xlu1 %1348 }
 0xed9   :  { %v1353_v61 = vmul.f32 0.03125, %v1349_v59 }
 0xeda   :  { %v1352_v48 = vpop.xlane.xlu0 %1351 }
 0xedb   :  { %v1354_v62 = vmul.f32 0.03125, %v1352_v48  ;;  %v1365_v50 = vmul.f32 %v1353_v61, %v1353_v61  ;;  %v1371_v0 = vsub.f32 %v1345_v60, %v1353_v61 }
 0xedc   :  { %v1359_v2 = vpop.xlane.xlu1 %1358 }
 0xedd   :  { %v1363_v3 = vmul.f32 0.03125, %v1359_v2  ;;  %v1366_v5 = vmul.f32 %v1354_v62, %v1354_v62  ;;  %v1372_v15 = vsub.f32 %v1346_v25, %v1354_v62 }
 0xede   :  { %v1362_v4 = vpop.xlane.xlu0 %1361 }
 0xedf   :  { %v1367_v6 = vsub.f32 %v1363_v3, %v1365_v50  ;;  %v1364_v42 = vmul.f32 0.03125, %v1362_v4 }
 0xee1   :  { %v1369_v8 = vmax.f32 %v1367_v6, 0.0  ;;  %v1368_v11 = vsub.f32 %v1364_v42, %v1366_v5 }
 0xee3   :  { %v1373_v12 = vadd.f32 1e-12, %v1369_v8  ;;  %v1370_v13 = vmax.f32 %v1368_v11, 0.0 }
 0xee5   :  { %1840 = vrsqrt.f32 %v1373_v12  ;;  %v1374_v14 = vadd.f32 1e-12, %v1370_v13 }
 0xee7   :  { %1842 = vrsqrt.f32 %v1374_v14 }
 0xeef   :  { %v1841_v1 = vpop.eup %1840 }
 0xef0   :  { %v1377_v18 = vmul.f32 %v1841_v1, %v1371_v0 }
 0xef1   :  { %v1843_v19 = vpop.eup %1842 }
 0xef2   :  { %v1378_v26 = vmul.f32 %v1843_v19, %v1372_v15  ;;  %v1384_v21 = vmul.f32 %v1469_v17, %v1377_v18 }
 0xef4   :  { %v1385_v28 = vmul.f32 %v1469_v17, %v1378_v26  ;;  %v1391_v20 = vadd.f32 %v1470_v16, %v1384_v21 }
 0xef6   :  { %v1392_v29 = vadd.f32 %v1470_v16, %v1385_v28  ;;  %1393 = vst.msk [vmem:[#allocation2] sm:$0xff] %vm31_vm0, %v1391_v20 }
 0xef8   :  { %1394 = vst.msk [vmem:[#allocation2 + $0x8] sm:$0xff] %vm31_vm0, %v1392_v29 }
 0xef9   :  { %1855 = shalt.err (!%p1852_p4)
}
 0xefa   :  { %s1856_s12 = scalar_lea.hbm %s2416_s7, 256 }
 0xefb   :  { %p1857_p5 = scmp.ne.s32.totalorder %s2416_s7, %s1856_s12  ;;  %p1860_p6 = scmp.lt.u32.totalorder %s1856_s12, %s2416_s7 }
 0xefd   :  { %p1862_p7 = pnand %p1860_p6, %p1857_p5 }
 0xeff   :  { %1865 = shalt.err (!%p1862_p7)
}
 0xf00   :  { %s1876_s17 = smov 128   ;;  %s1877_s18 = smov 8  }
 0xf01   :  { %1406 = dma.vmem_to_hbm [thread:$0]  %s1401_s10, 256, %s2416_s7, [#allocation3], %s1876_s17, %s1876_s17, %s1877_s18  }
 0xf02   :  { %1866 = dma.done.wait [#allocation3], 256  }
 0xf03   :  { %1867 = vsyncadd [#allocation3], 4294967040 }
 0xf04   :  { %1410 = vsyncpa [#allocation3], 1 }

</bundles_post_ra>
